<compile_context>
chip_gen: v7x
topology: tpu7x:2x2x1
jax: 0.10.0
libtpu: 0.0.40
codegen_flags: <defaults>
</compile_context>

<pallas_src>
import functools

import jax
import jax.numpy as jnp
from jax.experimental import pallas as pl

N_MELS = 32


# ----------------------------- Pallas kernel ------------------------------

def _lstms_fused_kernel(x_ref, wih1_ref, b1_ref, whh1_ref,
                        wih2_ref, b2_ref, whh2f_ref,
                        wfc_ref, bfc_ref, o_ref, *, T, B, H):
    f32 = jnp.float32

    # Hoist all loop-invariant loads.
    x2d = x_ref[...]            # (T*B, I), time-major rows
    wih1 = wih1_ref[...]        # (I, 8H)
    b1 = b1_ref[...]            # (1, 8H)
    whh1 = whh1_ref[...]        # (2H, 4H)
    wih2 = wih2_ref[...]        # (2H, 8H)
    b2 = b2_ref[...]            # (1, 8H)
    whh2f = whh2f_ref[...]      # (H, 4H)

    def cell(gates, c):
        # Two full-width transcendental evaluations + static slices.
        sg = jax.nn.sigmoid(gates)
        tg = jnp.tanh(gates)
        i_g = sg[:, 0 * H:1 * H]
        f_g = sg[:, 1 * H:2 * H]
        g_g = tg[:, 2 * H:3 * H]
        o_g = sg[:, 3 * H:4 * H]
        c_new = f_g * c + i_g * g_g
        h_new = o_g * jnp.tanh(c_new)
        return h_new, c_new

    # ---- layer 1: one wide matmul for all timesteps & both directions ----
    gx1 = jnp.dot(x2d, wih1, preferred_element_type=f32) + b1      # (T*B, 8H)

    # Row masks to place fwd / bwd hidden into the stacked recurrent LHS.
    mask_f = jnp.concatenate(
        [jnp.ones((B, 1), f32), jnp.zeros((B, 1), f32)], axis=0)    # (2B, 1)
    mask_b = 1.0 - mask_f

    h1 = jnp.zeros((2 * B, H), f32)       # rows 0:B fwd, rows B:2B bwd
    c1 = jnp.zeros((2 * B, H), f32)
    fwd_h = [None] * T
    bwd_h = [None] * T                    # indexed by time
    for s in range(T):
        gx_f = gx1[s * B:(s + 1) * B, 0:4 * H]                  # fwd, time s
        gx_b = gx1[(T - 1 - s) * B:(T - s) * B, 4 * H:8 * H]    # bwd, time T-1-s
        gx = jnp.concatenate([gx_f, gx_b], axis=0)              # (2B, 4H)
        # One merged recurrent matmul for both directions.
        lhs = jnp.concatenate([h1 * mask_f, h1 * mask_b], axis=1)  # (2B, 2H)
        gates = gx + jnp.dot(lhs, whh1, preferred_element_type=f32)
        h1, c1 = cell(gates, c1)
        fwd_h[s] = h1[0:B]
        bwd_h[T - 1 - s] = h1[B:2 * B]

    # Layer-1 output, time-major rows, features = [fwd | bwd].
    act1 = jnp.concatenate(
        [jnp.concatenate([fwd_h[t], bwd_h[t]], axis=1) for t in range(T)],
        axis=0)                                                  # (T*B, 2H)

    # ---- layer 2: wide input-projection matmul for both directions ----
    gx2 = jnp.dot(act1, wih2, preferred_element_type=f32) + b2    # (T*B, 8H)

    # Forward direction: full recurrence, only the final h is needed.
    h2 = jnp.zeros((B, H), f32)
    c2 = jnp.zeros((B, H), f32)
    for t in range(T):
        gates = gx2[t * B:(t + 1) * B, 0:4 * H] + jnp.dot(
            h2, whh2f, preferred_element_type=f32)
        h2, c2 = cell(gates, c2)

    # Backward direction: output[:, -1, :] only needs its FIRST step
    # (time T-1, zero initial state => no recurrent term).
    gates_b = gx2[(T - 1) * B:T * B, 4 * H:8 * H]
    h2b, _ = cell(gates_b, jnp.zeros((B, H), f32))

    # ---- fused FC + sigmoid on the last-timestep features ----
    feat = jnp.concatenate([h2, h2b], axis=1)                     # (B, 2H)
    out = jax.nn.sigmoid(
        jnp.dot(feat, wfc_ref[...], preferred_element_type=f32) + bfc_ref[...])
    o_ref[...] = out.astype(o_ref.dtype)


# ------------------------------- wrapper -----------------------------------

def _full_spec(a):
    zeros = (0,) * a.ndim
    return pl.BlockSpec(a.shape, lambda: zeros)


@jax.jit
def lstms_forward(x, packed):
    """x: (B, T, n_mels) float32 -> (B, output_size) float32."""
    B, T, I = x.shape
    H = packed["whh2f"].shape[0]
    O = packed["w_fc"].shape[1]

    # Time-major, flattened rows (t-major, then batch): row = t*B + b.
    x2d = jnp.transpose(x, (1, 0, 2)).reshape(T * B, I).astype(jnp.float32)

    args = (x2d, packed["wih1"], packed["b1"], packed["whh1"],
            packed["wih2"], packed["b2"], packed["whh2f"],
            packed["w_fc"], packed["b_fc"])

    kernel = functools.partial(_lstms_fused_kernel, T=T, B=B, H=H)
    return pl.pallas_call(
        kernel,
        out_shape=jax.ShapeDtypeStruct((B, O), jnp.float32),
        in_specs=[_full_spec(a) for a in args],
        out_specs=pl.BlockSpec((B, O), lambda: (0, 0)),
    )(*args)


# --------------------------- params & packing ------------------------------

def init_params(key, n_mels, hidden_size, output_size, num_layers,
                num_directions):
    """Deterministic synthetic params (PyTorch-style uniform init)."""
    params = {"lstm": [], "fc": None}
    k_scale = 1.0 / jnp.sqrt(hidden_size)
    for layer in range(num_layers):
        in_size = n_mels if layer == 0 else hidden_size * num_directions
        dirs = []
        for _ in range(num_directions):
            key, k1, k2, k3, k4 = jax.random.split(key, 5)
            w_ih = jax.random.uniform(k1, (in_size, 4 * hidden_size),
                                      jnp.float32, -k_scale, k_scale)
            w_hh = jax.random.uniform(k2, (hidden_size, 4 * hidden_size),
                                      jnp.float32, -k_scale, k_scale)
            b_ih = jax.random.uniform(k3, (4 * hidden_size,),
                                      jnp.float32, -k_scale, k_scale)
            b_hh = jax.random.uniform(k4, (4 * hidden_size,),
                                      jnp.float32, -k_scale, k_scale)
            dirs.append((w_ih, w_hh, (b_ih + b_hh)[None, :]))
        params["lstm"].append(dirs)
    key, kf1, kf2 = jax.random.split(key, 3)
    fc_in = hidden_size * num_directions
    f_scale = 1.0 / jnp.sqrt(fc_in)
    w_fc = jax.random.uniform(kf1, (fc_in, output_size),
                              jnp.float32, -f_scale, f_scale)
    b_fc = jax.random.uniform(kf2, (1, output_size),
                              jnp.float32, -f_scale, f_scale)
    params["fc"] = (w_fc, b_fc)
    return params


def pack_params(params):
    """Pack per-direction weights into the fused-kernel layout."""
    assert len(params["lstm"]) == 2 and len(params["lstm"][0]) == 2, \
        "fused kernel expects num_layers=2, bidirectional=True"
    (wih1f, whh1f, b1f), (wih1b, whh1b, b1b) = params["lstm"][0]
    (wih2f, whh2f, b2f), (wih2b, _whh2b, b2b) = params["lstm"][1]
    w_fc, b_fc = params["fc"]
    return dict(
        wih1=jnp.concatenate([wih1f, wih1b], axis=1),     # (I, 8H)
        b1=jnp.concatenate([b1f, b1b], axis=1),           # (1, 8H)
        whh1=jnp.concatenate([whh1f, whh1b], axis=0),     # (2H, 4H)
        wih2=jnp.concatenate([wih2f, wih2b], axis=1),     # (2H, 8H)
        b2=jnp.concatenate([b2f, b2b], axis=1),           # (1, 8H)
        whh2f=whh2f,                                      # (H, 4H)
        w_fc=w_fc,                                        # (2H, O)
        b_fc=b_fc,                                        # (1, O)
    )


# ------------------------- pure-JAX reference ------------------------------

def _ref_forward(x, params):
    inp = jnp.transpose(x, (1, 0, 2)).astype(jnp.float32)

    def cell(w_ih, w_hh, b):
        H = w_hh.shape[0]

        def step(carry, x_t):
            h, c = carry
            g = x_t @ w_ih + h @ w_hh + b
            i = jax.nn.sigmoid(g[:, 0*H:1*H]); f = jax.nn.sigmoid(g[:, 1*H:2*H])
            gg = jnp.tanh(g[:, 2*H:3*H]);      o = jax.nn.sigmoid(g[:, 3*H:4*H])
            c = f * c + i * gg
            h = o * jnp.tanh(c)
            return (h, c), h
        return step

    for dirs in params["lstm"]:
        outs = []
        for d, (w_ih, w_hh, b) in enumerate(dirs):
            xin = inp if d == 0 else inp[::-1]
            B = xin.shape[1]; H = w_hh.shape[0]
            init = (jnp.zeros((B, H)), jnp.zeros((B, H)))
            _, ys = jax.lax.scan(cell(w_ih, w_hh, b), init, xin)
            if d == 1:
                ys = ys[::-1]
            outs.append(ys)
        inp = jnp.concatenate(outs, axis=-1)
    w_fc, b_fc = params["fc"]
    return jax.nn.sigmoid(inp[-1] @ w_fc + b_fc)


# --------------------------------- main ------------------------------------

if __name__ == "__main__":
    batch, seq = 2, 8
    n_mels, hidden_size, output_size = N_MELS, 32, 16
    num_layers, num_directions = 2, 2

    key = jax.random.PRNGKey(0)
    key, kx, kp = jax.random.split(key, 3)
    x = jax.random.normal(kx, (batch, seq, n_mels), dtype=jnp.float32)
    params = init_params(kp, n_mels, hidden_size, output_size,
                         num_layers, num_directions)
    packed = pack_params(params)

    out = lstms_forward(x, packed)
    out = jax.block_until_ready(out)
    assert out.shape == (batch, output_size), out.shape

    ref = jax.block_until_ready(_ref_forward(x, params))
    assert jnp.allclose(out, ref, atol=2e-3, rtol=2e-3), \
        float(jnp.max(jnp.abs(out - ref)))

    print("KERNEL_OK")
</pallas_src>

<mosaic_0001>
module attributes {stable_mosaic.version = 11 : i64} {
  func.func @_lstms_fused_kernel(%arg0: memref<16x32xf32, #tpu.memory_space<vmem>>, %arg1: memref<32x256xf32, #tpu.memory_space<vmem>>, %arg2: memref<1x256xf32, #tpu.memory_space<vmem>>, %arg3: memref<64x128xf32, #tpu.memory_space<vmem>>, %arg4: memref<64x256xf32, #tpu.memory_space<vmem>>, %arg5: memref<1x256xf32, #tpu.memory_space<vmem>>, %arg6: memref<32x128xf32, #tpu.memory_space<vmem>>, %arg7: memref<64x16xf32, #tpu.memory_space<vmem>>, %arg8: memref<1x16xf32, #tpu.memory_space<vmem>>, %arg9: memref<2x16xf32, #tpu.memory_space<vmem>>) attributes {dimension_semantics = [], scalar_prefetch = 0 : i64, scratch_operands = 0 : i64, tpu.core_type = #tpu.core_type<tc>} {
    %c0 = arith.constant 0 : index
    %c0_0 = arith.constant 0 : index
    %0 = vector.load %arg0[%c0, %c0_0] : memref<16x32xf32, #tpu.memory_space<vmem>>, vector<16x32xf32>
    %c0_1 = arith.constant 0 : index
    %c0_2 = arith.constant 0 : index
    %1 = vector.load %arg1[%c0_1, %c0_2] : memref<32x256xf32, #tpu.memory_space<vmem>>, vector<32x256xf32>
    %c0_3 = arith.constant 0 : index
    %c0_4 = arith.constant 0 : index
    %2 = vector.load %arg2[%c0_3, %c0_4] : memref<1x256xf32, #tpu.memory_space<vmem>>, vector<1x256xf32>
    %c0_5 = arith.constant 0 : index
    %c0_6 = arith.constant 0 : index
    %3 = vector.load %arg3[%c0_5, %c0_6] : memref<64x128xf32, #tpu.memory_space<vmem>>, vector<64x128xf32>
    %c0_7 = arith.constant 0 : index
    %c0_8 = arith.constant 0 : index
    %4 = vector.load %arg4[%c0_7, %c0_8] : memref<64x256xf32, #tpu.memory_space<vmem>>, vector<64x256xf32>
    %c0_9 = arith.constant 0 : index
    %c0_10 = arith.constant 0 : index
    %5 = vector.load %arg5[%c0_9, %c0_10] : memref<1x256xf32, #tpu.memory_space<vmem>>, vector<1x256xf32>
    %c0_11 = arith.constant 0 : index
    %c0_12 = arith.constant 0 : index
    %6 = vector.load %arg6[%c0_11, %c0_12] : memref<32x128xf32, #tpu.memory_space<vmem>>, vector<32x128xf32>
    %cst = arith.constant dense<0.000000e+00> : vector<16x256xf32>
    %7 = tpu.matmul %0, %1, %cst {dimension_numbers = #tpu.dot_dimension_numbers<[1], [0], [0], [1], [0, 0, 1, 1], [], []>} : vector<16x32xf32>, vector<32x256xf32>, vector<16x256xf32> -> vector<16x256xf32>
    %8 = vector.broadcast %2 : vector<1x256xf32> to vector<16x256xf32>
    %9 = arith.addf %7, %8 : vector<16x256xf32>
    %cst_13 = arith.constant 1.000000e+00 : f32
    %10 = vector.broadcast %cst_13 : f32 to vector<2x1xf32>
    %cst_14 = arith.constant 0.000000e+00 : f32
    %11 = vector.broadcast %cst_14 : f32 to vector<2x1xf32>
    %12 = tpu.concatenate %10, %11 in 0 : vector<2x1xf32>, vector<2x1xf32> -> vector<4x1xf32>
    %cst_15 = arith.constant 1.000000e+00 : f32
    %13 = vector.broadcast %cst_15 : f32 to vector<4x1xf32>
    %14 = arith.subf %13, %12 : vector<4x1xf32>
    %cst_16 = arith.constant 0.000000e+00 : f32
    %15 = vector.broadcast %cst_16 : f32 to vector<4x32xf32>
    %cst_17 = arith.constant 0.000000e+00 : f32
    %16 = vector.broadcast %cst_17 : f32 to vector<4x32xf32>
    %17 = vector.extract_strided_slice %9 {offsets = [0, 0], sizes = [2, 128], strides = [1, 1]} : vector<16x256xf32> to vector<2x128xf32>
    %18 = vector.extract_strided_slice %9 {offsets = [14, 128], sizes = [2, 128], strides = [1, 1]} : vector<16x256xf32> to vector<2x128xf32>
    %19 = tpu.concatenate %17, %18 in 0 : vector<2x128xf32>, vector<2x128xf32> -> vector<4x128xf32>
    %20 = vector.broadcast %12 : vector<4x1xf32> to vector<4x32xf32>
    %21 = arith.mulf %15, %20 : vector<4x32xf32>
    %22 = vector.broadcast %14 : vector<4x1xf32> to vector<4x32xf32>
    %23 = arith.mulf %15, %22 : vector<4x32xf32>
    %24 = tpu.concatenate %21, %23 in 1 : vector<4x32xf32>, vector<4x32xf32> -> vector<4x64xf32>
    %cst_18 = arith.constant dense<0.000000e+00> : vector<4x128xf32>
    %25 = tpu.matmul %24, %3, %cst_18 {dimension_numbers = #tpu.dot_dimension_numbers<[1], [0], [0], [1], [0, 0, 1, 1], [], []>} : vector<4x64xf32>, vector<64x128xf32>, vector<4x128xf32> -> vector<4x128xf32>
    %26 = arith.addf %19, %25 : vector<4x128xf32>
    %27 = arith.negf %26 : vector<4x128xf32>
    %28 = math.exp %27 : vector<4x128xf32>
    %cst_19 = arith.constant 1.000000e+00 : f32
    %29 = vector.broadcast %cst_19 : f32 to vector<4x128xf32>
    %30 = arith.addf %29, %28 : vector<4x128xf32>
    %31 = arith.divf %29, %30 : vector<4x128xf32>
    %32 = math.tanh %26 : vector<4x128xf32>
    %33 = vector.extract_strided_slice %31 {offsets = [0, 0], sizes = [4, 32], strides = [1, 1]} : vector<4x128xf32> to vector<4x32xf32>
    %34 = vector.extract_strided_slice %31 {offsets = [0, 32], sizes = [4, 32], strides = [1, 1]} : vector<4x128xf32> to vector<4x32xf32>
    %35 = vector.extract_strided_slice %32 {offsets = [0, 64], sizes = [4, 32], strides = [1, 1]} : vector<4x128xf32> to vector<4x32xf32>
    %36 = vector.extract_strided_slice %31 {offsets = [0, 96], sizes = [4, 32], strides = [1, 1]} : vector<4x128xf32> to vector<4x32xf32>
    %37 = arith.mulf %34, %16 : vector<4x32xf32>
    %38 = arith.mulf %33, %35 : vector<4x32xf32>
    %39 = arith.addf %37, %38 : vector<4x32xf32>
    %40 = math.tanh %39 : vector<4x32xf32>
    %41 = arith.mulf %36, %40 : vector<4x32xf32>
    %42 = vector.extract_strided_slice %41 {offsets = [0, 0], sizes = [2, 32], strides = [1, 1]} : vector<4x32xf32> to vector<2x32xf32>
    %43 = vector.extract_strided_slice %41 {offsets = [2, 0], sizes = [2, 32], strides = [1, 1]} : vector<4x32xf32> to vector<2x32xf32>
    %44 = vector.extract_strided_slice %9 {offsets = [2, 0], sizes = [2, 128], strides = [1, 1]} : vector<16x256xf32> to vector<2x128xf32>
    %45 = vector.extract_strided_slice %9 {offsets = [12, 128], sizes = [2, 128], strides = [1, 1]} : vector<16x256xf32> to vector<2x128xf32>
    %46 = tpu.concatenate %44, %45 in 0 : vector<2x128xf32>, vector<2x128xf32> -> vector<4x128xf32>
    %47 = vector.broadcast %12 : vector<4x1xf32> to vector<4x32xf32>
    %48 = arith.mulf %41, %47 : vector<4x32xf32>
    %49 = vector.broadcast %14 : vector<4x1xf32> to vector<4x32xf32>
    %50 = arith.mulf %41, %49 : vector<4x32xf32>
    %51 = tpu.concatenate %48, %50 in 1 : vector<4x32xf32>, vector<4x32xf32> -> vector<4x64xf32>
    %cst_20 = arith.constant dense<0.000000e+00> : vector<4x128xf32>
    %52 = tpu.matmul %51, %3, %cst_20 {dimension_numbers = #tpu.dot_dimension_numbers<[1], [0], [0], [1], [0, 0, 1, 1], [], []>} : vector<4x64xf32>, vector<64x128xf32>, vector<4x128xf32> -> vector<4x128xf32>
    %53 = arith.addf %46, %52 : vector<4x128xf32>
    %54 = arith.negf %53 : vector<4x128xf32>
    %55 = math.exp %54 : vector<4x128xf32>
    %cst_21 = arith.constant 1.000000e+00 : f32
    %56 = vector.broadcast %cst_21 : f32 to vector<4x128xf32>
    %57 = arith.addf %56, %55 : vector<4x128xf32>
    %58 = arith.divf %56, %57 : vector<4x128xf32>
    %59 = math.tanh %53 : vector<4x128xf32>
    %60 = vector.extract_strided_slice %58 {offsets = [0, 0], sizes = [4, 32], strides = [1, 1]} : vector<4x128xf32> to vector<4x32xf32>
    %61 = vector.extract_strided_slice %58 {offsets = [0, 32], sizes = [4, 32], strides = [1, 1]} : vector<4x128xf32> to vector<4x32xf32>
    %62 = vector.extract_strided_slice %59 {offsets = [0, 64], sizes = [4, 32], strides = [1, 1]} : vector<4x128xf32> to vector<4x32xf32>
    %63 = vector.extract_strided_slice %58 {offsets = [0, 96], sizes = [4, 32], strides = [1, 1]} : vector<4x128xf32> to vector<4x32xf32>
    %64 = arith.mulf %61, %39 : vector<4x32xf32>
    %65 = arith.mulf %60, %62 : vector<4x32xf32>
    %66 = arith.addf %64, %65 : vector<4x32xf32>
    %67 = math.tanh %66 : vector<4x32xf32>
    %68 = arith.mulf %63, %67 : vector<4x32xf32>
    %69 = vector.extract_strided_slice %68 {offsets = [0, 0], sizes = [2, 32], strides = [1, 1]} : vector<4x32xf32> to vector<2x32xf32>
    %70 = vector.extract_strided_slice %68 {offsets = [2, 0], sizes = [2, 32], strides = [1, 1]} : vector<4x32xf32> to vector<2x32xf32>
    %71 = vector.extract_strided_slice %9 {offsets = [4, 0], sizes = [2, 128], strides = [1, 1]} : vector<16x256xf32> to vector<2x128xf32>
    %72 = vector.extract_strided_slice %9 {offsets = [10, 128], sizes = [2, 128], strides = [1, 1]} : vector<16x256xf32> to vector<2x128xf32>
    %73 = tpu.concatenate %71, %72 in 0 : vector<2x128xf32>, vector<2x128xf32> -> vector<4x128xf32>
    %74 = vector.broadcast %12 : vector<4x1xf32> to vector<4x32xf32>
    %75 = arith.mulf %68, %74 : vector<4x32xf32>
    %76 = vector.broadcast %14 : vector<4x1xf32> to vector<4x32xf32>
    %77 = arith.mulf %68, %76 : vector<4x32xf32>
    %78 = tpu.concatenate %75, %77 in 1 : vector<4x32xf32>, vector<4x32xf32> -> vector<4x64xf32>
    %cst_22 = arith.constant dense<0.000000e+00> : vector<4x128xf32>
    %79 = tpu.matmul %78, %3, %cst_22 {dimension_numbers = #tpu.dot_dimension_numbers<[1], [0], [0], [1], [0, 0, 1, 1], [], []>} : vector<4x64xf32>, vector<64x128xf32>, vector<4x128xf32> -> vector<4x128xf32>
    %80 = arith.addf %73, %79 : vector<4x128xf32>
    %81 = arith.negf %80 : vector<4x128xf32>
    %82 = math.exp %81 : vector<4x128xf32>
    %cst_23 = arith.constant 1.000000e+00 : f32
    %83 = vector.broadcast %cst_23 : f32 to vector<4x128xf32>
    %84 = arith.addf %83, %82 : vector<4x128xf32>
    %85 = arith.divf %83, %84 : vector<4x128xf32>
    %86 = math.tanh %80 : vector<4x128xf32>
    %87 = vector.extract_strided_slice %85 {offsets = [0, 0], sizes = [4, 32], strides = [1, 1]} : vector<4x128xf32> to vector<4x32xf32>
    %88 = vector.extract_strided_slice %85 {offsets = [0, 32], sizes = [4, 32], strides = [1, 1]} : vector<4x128xf32> to vector<4x32xf32>
    %89 = vector.extract_strided_slice %86 {offsets = [0, 64], sizes = [4, 32], strides = [1, 1]} : vector<4x128xf32> to vector<4x32xf32>
    %90 = vector.extract_strided_slice %85 {offsets = [0, 96], sizes = [4, 32], strides = [1, 1]} : vector<4x128xf32> to vector<4x32xf32>
    %91 = arith.mulf %88, %66 : vector<4x32xf32>
    %92 = arith.mulf %87, %89 : vector<4x32xf32>
    %93 = arith.addf %91, %92 : vector<4x32xf32>
    %94 = math.tanh %93 : vector<4x32xf32>
    %95 = arith.mulf %90, %94 : vector<4x32xf32>
    %96 = vector.extract_strided_slice %95 {offsets = [0, 0], sizes = [2, 32], strides = [1, 1]} : vector<4x32xf32> to vector<2x32xf32>
    %97 = vector.extract_strided_slice %95 {offsets = [2, 0], sizes = [2, 32], strides = [1, 1]} : vector<4x32xf32> to vector<2x32xf32>
    %98 = vector.extract_strided_slice %9 {offsets = [6, 0], sizes = [2, 128], strides = [1, 1]} : vector<16x256xf32> to vector<2x128xf32>
    %99 = vector.extract_strided_slice %9 {offsets = [8, 128], sizes = [2, 128], strides = [1, 1]} : vector<16x256xf32> to vector<2x128xf32>
    %100 = tpu.concatenate %98, %99 in 0 : vector<2x128xf32>, vector<2x128xf32> -> vector<4x128xf32>
    %101 = vector.broadcast %12 : vector<4x1xf32> to vector<4x32xf32>
    %102 = arith.mulf %95, %101 : vector<4x32xf32>
    %103 = vector.broadcast %14 : vector<4x1xf32> to vector<4x32xf32>
    %104 = arith.mulf %95, %103 : vector<4x32xf32>
    %105 = tpu.concatenate %102, %104 in 1 : vector<4x32xf32>, vector<4x32xf32> -> vector<4x64xf32>
    %cst_24 = arith.constant dense<0.000000e+00> : vector<4x128xf32>
    %106 = tpu.matmul %105, %3, %cst_24 {dimension_numbers = #tpu.dot_dimension_numbers<[1], [0], [0], [1], [0, 0, 1, 1], [], []>} : vector<4x64xf32>, vector<64x128xf32>, vector<4x128xf32> -> vector<4x128xf32>
    %107 = arith.addf %100, %106 : vector<4x128xf32>
    %108 = arith.negf %107 : vector<4x128xf32>
    %109 = math.exp %108 : vector<4x128xf32>
    %cst_25 = arith.constant 1.000000e+00 : f32
    %110 = vector.broadcast %cst_25 : f32 to vector<4x128xf32>
    %111 = arith.addf %110, %109 : vector<4x128xf32>
    %112 = arith.divf %110, %111 : vector<4x128xf32>
    %113 = math.tanh %107 : vector<4x128xf32>
    %114 = vector.extract_strided_slice %112 {offsets = [0, 0], sizes = [4, 32], strides = [1, 1]} : vector<4x128xf32> to vector<4x32xf32>
    %115 = vector.extract_strided_slice %112 {offsets = [0, 32], sizes = [4, 32], strides = [1, 1]} : vector<4x128xf32> to vector<4x32xf32>
    %116 = vector.extract_strided_slice %113 {offsets = [0, 64], sizes = [4, 32], strides = [1, 1]} : vector<4x128xf32> to vector<4x32xf32>
    %117 = vector.extract_strided_slice %112 {offsets = [0, 96], sizes = [4, 32], strides = [1, 1]} : vector<4x128xf32> to vector<4x32xf32>
    %118 = arith.mulf %115, %93 : vector<4x32xf32>
    %119 = arith.mulf %114, %116 : vector<4x32xf32>
    %120 = arith.addf %118, %119 : vector<4x32xf32>
    %121 = math.tanh %120 : vector<4x32xf32>
    %122 = arith.mulf %117, %121 : vector<4x32xf32>
    %123 = vector.extract_strided_slice %122 {offsets = [0, 0], sizes = [2, 32], strides = [1, 1]} : vector<4x32xf32> to vector<2x32xf32>
    %124 = vector.extract_strided_slice %122 {offsets = [2, 0], sizes = [2, 32], strides = [1, 1]} : vector<4x32xf32> to vector<2x32xf32>
    %125 = vector.extract_strided_slice %9 {offsets = [8, 0], sizes = [2, 128], strides = [1, 1]} : vector<16x256xf32> to vector<2x128xf32>
    %126 = vector.extract_strided_slice %9 {offsets = [6, 128], sizes = [2, 128], strides = [1, 1]} : vector<16x256xf32> to vector<2x128xf32>
    %127 = tpu.concatenate %125, %126 in 0 : vector<2x128xf32>, vector<2x128xf32> -> vector<4x128xf32>
    %128 = vector.broadcast %12 : vector<4x1xf32> to vector<4x32xf32>
    %129 = arith.mulf %122, %128 : vector<4x32xf32>
    %130 = vector.broadcast %14 : vector<4x1xf32> to vector<4x32xf32>
    %131 = arith.mulf %122, %130 : vector<4x32xf32>
    %132 = tpu.concatenate %129, %131 in 1 : vector<4x32xf32>, vector<4x32xf32> -> vector<4x64xf32>
    %cst_26 = arith.constant dense<0.000000e+00> : vector<4x128xf32>
    %133 = tpu.matmul %132, %3, %cst_26 {dimension_numbers = #tpu.dot_dimension_numbers<[1], [0], [0], [1], [0, 0, 1, 1], [], []>} : vector<4x64xf32>, vector<64x128xf32>, vector<4x128xf32> -> vector<4x128xf32>
    %134 = arith.addf %127, %133 : vector<4x128xf32>
    %135 = arith.negf %134 : vector<4x128xf32>
    %136 = math.exp %135 : vector<4x128xf32>
    %cst_27 = arith.constant 1.000000e+00 : f32
    %137 = vector.broadcast %cst_27 : f32 to vector<4x128xf32>
    %138 = arith.addf %137, %136 : vector<4x128xf32>
    %139 = arith.divf %137, %138 : vector<4x128xf32>
    %140 = math.tanh %134 : vector<4x128xf32>
    %141 = vector.extract_strided_slice %139 {offsets = [0, 0], sizes = [4, 32], strides = [1, 1]} : vector<4x128xf32> to vector<4x32xf32>
    %142 = vector.extract_strided_slice %139 {offsets = [0, 32], sizes = [4, 32], strides = [1, 1]} : vector<4x128xf32> to vector<4x32xf32>
    %143 = vector.extract_strided_slice %140 {offsets = [0, 64], sizes = [4, 32], strides = [1, 1]} : vector<4x128xf32> to vector<4x32xf32>
    %144 = vector.extract_strided_slice %139 {offsets = [0, 96], sizes = [4, 32], strides = [1, 1]} : vector<4x128xf32> to vector<4x32xf32>
    %145 = arith.mulf %142, %120 : vector<4x32xf32>
    %146 = arith.mulf %141, %143 : vector<4x32xf32>
    %147 = arith.addf %145, %146 : vector<4x32xf32>
    %148 = math.tanh %147 : vector<4x32xf32>
    %149 = arith.mulf %144, %148 : vector<4x32xf32>
    %150 = vector.extract_strided_slice %149 {offsets = [0, 0], sizes = [2, 32], strides = [1, 1]} : vector<4x32xf32> to vector<2x32xf32>
    %151 = vector.extract_strided_slice %149 {offsets = [2, 0], sizes = [2, 32], strides = [1, 1]} : vector<4x32xf32> to vector<2x32xf32>
    %152 = vector.extract_strided_slice %9 {offsets = [10, 0], sizes = [2, 128], strides = [1, 1]} : vector<16x256xf32> to vector<2x128xf32>
    %153 = vector.extract_strided_slice %9 {offsets = [4, 128], sizes = [2, 128], strides = [1, 1]} : vector<16x256xf32> to vector<2x128xf32>
    %154 = tpu.concatenate %152, %153 in 0 : vector<2x128xf32>, vector<2x128xf32> -> vector<4x128xf32>
    %155 = vector.broadcast %12 : vector<4x1xf32> to vector<4x32xf32>
    %156 = arith.mulf %149, %155 : vector<4x32xf32>
    %157 = vector.broadcast %14 : vector<4x1xf32> to vector<4x32xf32>
    %158 = arith.mulf %149, %157 : vector<4x32xf32>
    %159 = tpu.concatenate %156, %158 in 1 : vector<4x32xf32>, vector<4x32xf32> -> vector<4x64xf32>
    %cst_28 = arith.constant dense<0.000000e+00> : vector<4x128xf32>
    %160 = tpu.matmul %159, %3, %cst_28 {dimension_numbers = #tpu.dot_dimension_numbers<[1], [0], [0], [1], [0, 0, 1, 1], [], []>} : vector<4x64xf32>, vector<64x128xf32>, vector<4x128xf32> -> vector<4x128xf32>
    %161 = arith.addf %154, %160 : vector<4x128xf32>
    %162 = arith.negf %161 : vector<4x128xf32>
    %163 = math.exp %162 : vector<4x128xf32>
    %cst_29 = arith.constant 1.000000e+00 : f32
    %164 = vector.broadcast %cst_29 : f32 to vector<4x128xf32>
    %165 = arith.addf %164, %163 : vector<4x128xf32>
    %166 = arith.divf %164, %165 : vector<4x128xf32>
    %167 = math.tanh %161 : vector<4x128xf32>
    %168 = vector.extract_strided_slice %166 {offsets = [0, 0], sizes = [4, 32], strides = [1, 1]} : vector<4x128xf32> to vector<4x32xf32>
    %169 = vector.extract_strided_slice %166 {offsets = [0, 32], sizes = [4, 32], strides = [1, 1]} : vector<4x128xf32> to vector<4x32xf32>
    %170 = vector.extract_strided_slice %167 {offsets = [0, 64], sizes = [4, 32], strides = [1, 1]} : vector<4x128xf32> to vector<4x32xf32>
    %171 = vector.extract_strided_slice %166 {offsets = [0, 96], sizes = [4, 32], strides = [1, 1]} : vector<4x128xf32> to vector<4x32xf32>
    %172 = arith.mulf %169, %147 : vector<4x32xf32>
    %173 = arith.mulf %168, %170 : vector<4x32xf32>
    %174 = arith.addf %172, %173 : vector<4x32xf32>
    %175 = math.tanh %174 : vector<4x32xf32>
    %176 = arith.mulf %171, %175 : vector<4x32xf32>
    %177 = vector.extract_strided_slice %176 {offsets = [0, 0], sizes = [2, 32], strides = [1, 1]} : vector<4x32xf32> to vector<2x32xf32>
    %178 = vector.extract_strided_slice %176 {offsets = [2, 0], sizes = [2, 32], strides = [1, 1]} : vector<4x32xf32> to vector<2x32xf32>
    %179 = vector.extract_strided_slice %9 {offsets = [12, 0], sizes = [2, 128], strides = [1, 1]} : vector<16x256xf32> to vector<2x128xf32>
    %180 = vector.extract_strided_slice %9 {offsets = [2, 128], sizes = [2, 128], strides = [1, 1]} : vector<16x256xf32> to vector<2x128xf32>
    %181 = tpu.concatenate %179, %180 in 0 : vector<2x128xf32>, vector<2x128xf32> -> vector<4x128xf32>
    %182 = vector.broadcast %12 : vector<4x1xf32> to vector<4x32xf32>
    %183 = arith.mulf %176, %182 : vector<4x32xf32>
    %184 = vector.broadcast %14 : vector<4x1xf32> to vector<4x32xf32>
    %185 = arith.mulf %176, %184 : vector<4x32xf32>
    %186 = tpu.concatenate %183, %185 in 1 : vector<4x32xf32>, vector<4x32xf32> -> vector<4x64xf32>
    %cst_30 = arith.constant dense<0.000000e+00> : vector<4x128xf32>
    %187 = tpu.matmul %186, %3, %cst_30 {dimension_numbers = #tpu.dot_dimension_numbers<[1], [0], [0], [1], [0, 0, 1, 1], [], []>} : vector<4x64xf32>, vector<64x128xf32>, vector<4x128xf32> -> vector<4x128xf32>
    %188 = arith.addf %181, %187 : vector<4x128xf32>
    %189 = arith.negf %188 : vector<4x128xf32>
    %190 = math.exp %189 : vector<4x128xf32>
    %cst_31 = arith.constant 1.000000e+00 : f32
    %191 = vector.broadcast %cst_31 : f32 to vector<4x128xf32>
    %192 = arith.addf %191, %190 : vector<4x128xf32>
    %193 = arith.divf %191, %192 : vector<4x128xf32>
    %194 = math.tanh %188 : vector<4x128xf32>
    %195 = vector.extract_strided_slice %193 {offsets = [0, 0], sizes = [4, 32], strides = [1, 1]} : vector<4x128xf32> to vector<4x32xf32>
    %196 = vector.extract_strided_slice %193 {offsets = [0, 32], sizes = [4, 32], strides = [1, 1]} : vector<4x128xf32> to vector<4x32xf32>
    %197 = vector.extract_strided_slice %194 {offsets = [0, 64], sizes = [4, 32], strides = [1, 1]} : vector<4x128xf32> to vector<4x32xf32>
    %198 = vector.extract_strided_slice %193 {offsets = [0, 96], sizes = [4, 32], strides = [1, 1]} : vector<4x128xf32> to vector<4x32xf32>
    %199 = arith.mulf %196, %174 : vector<4x32xf32>
    %200 = arith.mulf %195, %197 : vector<4x32xf32>
    %201 = arith.addf %199, %200 : vector<4x32xf32>
    %202 = math.tanh %201 : vector<4x32xf32>
    %203 = arith.mulf %198, %202 : vector<4x32xf32>
    %204 = vector.extract_strided_slice %203 {offsets = [0, 0], sizes = [2, 32], strides = [1, 1]} : vector<4x32xf32> to vector<2x32xf32>
    %205 = vector.extract_strided_slice %203 {offsets = [2, 0], sizes = [2, 32], strides = [1, 1]} : vector<4x32xf32> to vector<2x32xf32>
    %206 = vector.extract_strided_slice %9 {offsets = [14, 0], sizes = [2, 128], strides = [1, 1]} : vector<16x256xf32> to vector<2x128xf32>
    %207 = vector.extract_strided_slice %9 {offsets = [0, 128], sizes = [2, 128], strides = [1, 1]} : vector<16x256xf32> to vector<2x128xf32>
    %208 = tpu.concatenate %206, %207 in 0 : vector<2x128xf32>, vector<2x128xf32> -> vector<4x128xf32>
    %209 = vector.broadcast %12 : vector<4x1xf32> to vector<4x32xf32>
    %210 = arith.mulf %203, %209 : vector<4x32xf32>
    %211 = vector.broadcast %14 : vector<4x1xf32> to vector<4x32xf32>
    %212 = arith.mulf %203, %211 : vector<4x32xf32>
    %213 = tpu.concatenate %210, %212 in 1 : vector<4x32xf32>, vector<4x32xf32> -> vector<4x64xf32>
    %cst_32 = arith.constant dense<0.000000e+00> : vector<4x128xf32>
    %214 = tpu.matmul %213, %3, %cst_32 {dimension_numbers = #tpu.dot_dimension_numbers<[1], [0], [0], [1], [0, 0, 1, 1], [], []>} : vector<4x64xf32>, vector<64x128xf32>, vector<4x128xf32> -> vector<4x128xf32>
    %215 = arith.addf %208, %214 : vector<4x128xf32>
    %216 = arith.negf %215 : vector<4x128xf32>
    %217 = math.exp %216 : vector<4x128xf32>
    %cst_33 = arith.constant 1.000000e+00 : f32
    %218 = vector.broadcast %cst_33 : f32 to vector<4x128xf32>
    %219 = arith.addf %218, %217 : vector<4x128xf32>
    %220 = arith.divf %218, %219 : vector<4x128xf32>
    %221 = math.tanh %215 : vector<4x128xf32>
    %222 = vector.extract_strided_slice %220 {offsets = [0, 0], sizes = [4, 32], strides = [1, 1]} : vector<4x128xf32> to vector<4x32xf32>
    %223 = vector.extract_strided_slice %220 {offsets = [0, 32], sizes = [4, 32], strides = [1, 1]} : vector<4x128xf32> to vector<4x32xf32>
    %224 = vector.extract_strided_slice %221 {offsets = [0, 64], sizes = [4, 32], strides = [1, 1]} : vector<4x128xf32> to vector<4x32xf32>
    %225 = vector.extract_strided_slice %220 {offsets = [0, 96], sizes = [4, 32], strides = [1, 1]} : vector<4x128xf32> to vector<4x32xf32>
    %226 = arith.mulf %223, %201 : vector<4x32xf32>
    %227 = arith.mulf %222, %224 : vector<4x32xf32>
    %228 = arith.addf %226, %227 : vector<4x32xf32>
    %229 = math.tanh %228 : vector<4x32xf32>
    %230 = arith.mulf %225, %229 : vector<4x32xf32>
    %231 = vector.extract_strided_slice %230 {offsets = [0, 0], sizes = [2, 32], strides = [1, 1]} : vector<4x32xf32> to vector<2x32xf32>
    %232 = vector.extract_strided_slice %230 {offsets = [2, 0], sizes = [2, 32], strides = [1, 1]} : vector<4x32xf32> to vector<2x32xf32>
    %233 = tpu.concatenate %42, %232 in 1 : vector<2x32xf32>, vector<2x32xf32> -> vector<2x64xf32>
    %234 = tpu.concatenate %69, %205 in 1 : vector<2x32xf32>, vector<2x32xf32> -> vector<2x64xf32>
    %235 = tpu.concatenate %96, %178 in 1 : vector<2x32xf32>, vector<2x32xf32> -> vector<2x64xf32>
    %236 = tpu.concatenate %123, %151 in 1 : vector<2x32xf32>, vector<2x32xf32> -> vector<2x64xf32>
    %237 = tpu.concatenate %150, %124 in 1 : vector<2x32xf32>, vector<2x32xf32> -> vector<2x64xf32>
    %238 = tpu.concatenate %177, %97 in 1 : vector<2x32xf32>, vector<2x32xf32> -> vector<2x64xf32>
    %239 = tpu.concatenate %204, %70 in 1 : vector<2x32xf32>, vector<2x32xf32> -> vector<2x64xf32>
    %240 = tpu.concatenate %231, %43 in 1 : vector<2x32xf32>, vector<2x32xf32> -> vector<2x64xf32>
    %241 = tpu.concatenate %233, %234, %235, %236, %237, %238, %239, %240 in 0 : vector<2x64xf32>, vector<2x64xf32>, vector<2x64xf32>, vector<2x64xf32>, vector<2x64xf32>, vector<2x64xf32>, vector<2x64xf32>, vector<2x64xf32> -> vector<16x64xf32>
    %cst_34 = arith.constant dense<0.000000e+00> : vector<16x256xf32>
    %242 = tpu.matmul %241, %4, %cst_34 {dimension_numbers = #tpu.dot_dimension_numbers<[1], [0], [0], [1], [0, 0, 1, 1], [], []>} : vector<16x64xf32>, vector<64x256xf32>, vector<16x256xf32> -> vector<16x256xf32>
    %243 = vector.broadcast %5 : vector<1x256xf32> to vector<16x256xf32>
    %244 = arith.addf %242, %243 : vector<16x256xf32>
    %cst_35 = arith.constant 0.000000e+00 : f32
    %245 = vector.broadcast %cst_35 : f32 to vector<2x32xf32>
    %cst_36 = arith.constant 0.000000e+00 : f32
    %246 = vector.broadcast %cst_36 : f32 to vector<2x32xf32>
    %247 = vector.extract_strided_slice %244 {offsets = [0, 0], sizes = [2, 128], strides = [1, 1]} : vector<16x256xf32> to vector<2x128xf32>
    %cst_37 = arith.constant dense<0.000000e+00> : vector<2x128xf32>
    %248 = tpu.matmul %245, %6, %cst_37 {dimension_numbers = #tpu.dot_dimension_numbers<[1], [0], [0], [1], [0, 0, 1, 1], [], []>} : vector<2x32xf32>, vector<32x128xf32>, vector<2x128xf32> -> vector<2x128xf32>
    %249 = arith.addf %247, %248 : vector<2x128xf32>
    %250 = arith.negf %249 : vector<2x128xf32>
    %251 = math.exp %250 : vector<2x128xf32>
    %cst_38 = arith.constant 1.000000e+00 : f32
    %252 = vector.broadcast %cst_38 : f32 to vector<2x128xf32>
    %253 = arith.addf %252, %251 : vector<2x128xf32>
    %254 = arith.divf %252, %253 : vector<2x128xf32>
    %255 = math.tanh %249 : vector<2x128xf32>
    %256 = vector.extract_strided_slice %254 {offsets = [0, 0], sizes = [2, 32], strides = [1, 1]} : vector<2x128xf32> to vector<2x32xf32>
    %257 = vector.extract_strided_slice %254 {offsets = [0, 32], sizes = [2, 32], strides = [1, 1]} : vector<2x128xf32> to vector<2x32xf32>
    %258 = vector.extract_strided_slice %255 {offsets = [0, 64], sizes = [2, 32], strides = [1, 1]} : vector<2x128xf32> to vector<2x32xf32>
    %259 = vector.extract_strided_slice %254 {offsets = [0, 96], sizes = [2, 32], strides = [1, 1]} : vector<2x128xf32> to vector<2x32xf32>
    %260 = arith.mulf %257, %246 : vector<2x32xf32>
    %261 = arith.mulf %256, %258 : vector<2x32xf32>
    %262 = arith.addf %260, %261 : vector<2x32xf32>
    %263 = math.tanh %262 : vector<2x32xf32>
    %264 = arith.mulf %259, %263 : vector<2x32xf32>
    %265 = vector.extract_strided_slice %244 {offsets = [2, 0], sizes = [2, 128], strides = [1, 1]} : vector<16x256xf32> to vector<2x128xf32>
    %cst_39 = arith.constant dense<0.000000e+00> : vector<2x128xf32>
    %266 = tpu.matmul %264, %6, %cst_39 {dimension_numbers = #tpu.dot_dimension_numbers<[1], [0], [0], [1], [0, 0, 1, 1], [], []>} : vector<2x32xf32>, vector<32x128xf32>, vector<2x128xf32> -> vector<2x128xf32>
    %267 = arith.addf %265, %266 : vector<2x128xf32>
    %268 = arith.negf %267 : vector<2x128xf32>
    %269 = math.exp %268 : vector<2x128xf32>
    %cst_40 = arith.constant 1.000000e+00 : f32
    %270 = vector.broadcast %cst_40 : f32 to vector<2x128xf32>
    %271 = arith.addf %270, %269 : vector<2x128xf32>
    %272 = arith.divf %270, %271 : vector<2x128xf32>
    %273 = math.tanh %267 : vector<2x128xf32>
    %274 = vector.extract_strided_slice %272 {offsets = [0, 0], sizes = [2, 32], strides = [1, 1]} : vector<2x128xf32> to vector<2x32xf32>
    %275 = vector.extract_strided_slice %272 {offsets = [0, 32], sizes = [2, 32], strides = [1, 1]} : vector<2x128xf32> to vector<2x32xf32>
    %276 = vector.extract_strided_slice %273 {offsets = [0, 64], sizes = [2, 32], strides = [1, 1]} : vector<2x128xf32> to vector<2x32xf32>
    %277 = vector.extract_strided_slice %272 {offsets = [0, 96], sizes = [2, 32], strides = [1, 1]} : vector<2x128xf32> to vector<2x32xf32>
    %278 = arith.mulf %275, %262 : vector<2x32xf32>
    %279 = arith.mulf %274, %276 : vector<2x32xf32>
    %280 = arith.addf %278, %279 : vector<2x32xf32>
    %281 = math.tanh %280 : vector<2x32xf32>
    %282 = arith.mulf %277, %281 : vector<2x32xf32>
    %283 = vector.extract_strided_slice %244 {offsets = [4, 0], sizes = [2, 128], strides = [1, 1]} : vector<16x256xf32> to vector<2x128xf32>
    %cst_41 = arith.constant dense<0.000000e+00> : vector<2x128xf32>
    %284 = tpu.matmul %282, %6, %cst_41 {dimension_numbers = #tpu.dot_dimension_numbers<[1], [0], [0], [1], [0, 0, 1, 1], [], []>} : vector<2x32xf32>, vector<32x128xf32>, vector<2x128xf32> -> vector<2x128xf32>
    %285 = arith.addf %283, %284 : vector<2x128xf32>
    %286 = arith.negf %285 : vector<2x128xf32>
    %287 = math.exp %286 : vector<2x128xf32>
    %cst_42 = arith.constant 1.000000e+00 : f32
    %288 = vector.broadcast %cst_42 : f32 to vector<2x128xf32>
    %289 = arith.addf %288, %287 : vector<2x128xf32>
    %290 = arith.divf %288, %289 : vector<2x128xf32>
    %291 = math.tanh %285 : vector<2x128xf32>
    %292 = vector.extract_strided_slice %290 {offsets = [0, 0], sizes = [2, 32], strides = [1, 1]} : vector<2x128xf32> to vector<2x32xf32>
    %293 = vector.extract_strided_slice %290 {offsets = [0, 32], sizes = [2, 32], strides = [1, 1]} : vector<2x128xf32> to vector<2x32xf32>
    %294 = vector.extract_strided_slice %291 {offsets = [0, 64], sizes = [2, 32], strides = [1, 1]} : vector<2x128xf32> to vector<2x32xf32>
    %295 = vector.extract_strided_slice %290 {offsets = [0, 96], sizes = [2, 32], strides = [1, 1]} : vector<2x128xf32> to vector<2x32xf32>
    %296 = arith.mulf %293, %280 : vector<2x32xf32>
    %297 = arith.mulf %292, %294 : vector<2x32xf32>
    %298 = arith.addf %296, %297 : vector<2x32xf32>
    %299 = math.tanh %298 : vector<2x32xf32>
    %300 = arith.mulf %295, %299 : vector<2x32xf32>
    %301 = vector.extract_strided_slice %244 {offsets = [6, 0], sizes = [2, 128], strides = [1, 1]} : vector<16x256xf32> to vector<2x128xf32>
    %cst_43 = arith.constant dense<0.000000e+00> : vector<2x128xf32>
    %302 = tpu.matmul %300, %6, %cst_43 {dimension_numbers = #tpu.dot_dimension_numbers<[1], [0], [0], [1], [0, 0, 1, 1], [], []>} : vector<2x32xf32>, vector<32x128xf32>, vector<2x128xf32> -> vector<2x128xf32>
    %303 = arith.addf %301, %302 : vector<2x128xf32>
    %304 = arith.negf %303 : vector<2x128xf32>
    %305 = math.exp %304 : vector<2x128xf32>
    %cst_44 = arith.constant 1.000000e+00 : f32
    %306 = vector.broadcast %cst_44 : f32 to vector<2x128xf32>
    %307 = arith.addf %306, %305 : vector<2x128xf32>
    %308 = arith.divf %306, %307 : vector<2x128xf32>
    %309 = math.tanh %303 : vector<2x128xf32>
    %310 = vector.extract_strided_slice %308 {offsets = [0, 0], sizes = [2, 32], strides = [1, 1]} : vector<2x128xf32> to vector<2x32xf32>
    %311 = vector.extract_strided_slice %308 {offsets = [0, 32], sizes = [2, 32], strides = [1, 1]} : vector<2x128xf32> to vector<2x32xf32>
    %312 = vector.extract_strided_slice %309 {offsets = [0, 64], sizes = [2, 32], strides = [1, 1]} : vector<2x128xf32> to vector<2x32xf32>
    %313 = vector.extract_strided_slice %308 {offsets = [0, 96], sizes = [2, 32], strides = [1, 1]} : vector<2x128xf32> to vector<2x32xf32>
    %314 = arith.mulf %311, %298 : vector<2x32xf32>
    %315 = arith.mulf %310, %312 : vector<2x32xf32>
    %316 = arith.addf %314, %315 : vector<2x32xf32>
    %317 = math.tanh %316 : vector<2x32xf32>
    %318 = arith.mulf %313, %317 : vector<2x32xf32>
    %319 = vector.extract_strided_slice %244 {offsets = [8, 0], sizes = [2, 128], strides = [1, 1]} : vector<16x256xf32> to vector<2x128xf32>
    %cst_45 = arith.constant dense<0.000000e+00> : vector<2x128xf32>
    %320 = tpu.matmul %318, %6, %cst_45 {dimension_numbers = #tpu.dot_dimension_numbers<[1], [0], [0], [1], [0, 0, 1, 1], [], []>} : vector<2x32xf32>, vector<32x128xf32>, vector<2x128xf32> -> vector<2x128xf32>
    %321 = arith.addf %319, %320 : vector<2x128xf32>
    %322 = arith.negf %321 : vector<2x128xf32>
    %323 = math.exp %322 : vector<2x128xf32>
    %cst_46 = arith.constant 1.000000e+00 : f32
    %324 = vector.broadcast %cst_46 : f32 to vector<2x128xf32>
    %325 = arith.addf %324, %323 : vector<2x128xf32>
    %326 = arith.divf %324, %325 : vector<2x128xf32>
    %327 = math.tanh %321 : vector<2x128xf32>
    %328 = vector.extract_strided_slice %326 {offsets = [0, 0], sizes = [2, 32], strides = [1, 1]} : vector<2x128xf32> to vector<2x32xf32>
    %329 = vector.extract_strided_slice %326 {offsets = [0, 32], sizes = [2, 32], strides = [1, 1]} : vector<2x128xf32> to vector<2x32xf32>
    %330 = vector.extract_strided_slice %327 {offsets = [0, 64], sizes = [2, 32], strides = [1, 1]} : vector<2x128xf32> to vector<2x32xf32>
    %331 = vector.extract_strided_slice %326 {offsets = [0, 96], sizes = [2, 32], strides = [1, 1]} : vector<2x128xf32> to vector<2x32xf32>
    %332 = arith.mulf %329, %316 : vector<2x32xf32>
    %333 = arith.mulf %328, %330 : vector<2x32xf32>
    %334 = arith.addf %332, %333 : vector<2x32xf32>
    %335 = math.tanh %334 : vector<2x32xf32>
    %336 = arith.mulf %331, %335 : vector<2x32xf32>
    %337 = vector.extract_strided_slice %244 {offsets = [10, 0], sizes = [2, 128], strides = [1, 1]} : vector<16x256xf32> to vector<2x128xf32>
    %cst_47 = arith.constant dense<0.000000e+00> : vector<2x128xf32>
    %338 = tpu.matmul %336, %6, %cst_47 {dimension_numbers = #tpu.dot_dimension_numbers<[1], [0], [0], [1], [0, 0, 1, 1], [], []>} : vector<2x32xf32>, vector<32x128xf32>, vector<2x128xf32> -> vector<2x128xf32>
    %339 = arith.addf %337, %338 : vector<2x128xf32>
    %340 = arith.negf %339 : vector<2x128xf32>
    %341 = math.exp %340 : vector<2x128xf32>
    %cst_48 = arith.constant 1.000000e+00 : f32
    %342 = vector.broadcast %cst_48 : f32 to vector<2x128xf32>
    %343 = arith.addf %342, %341 : vector<2x128xf32>
    %344 = arith.divf %342, %343 : vector<2x128xf32>
    %345 = math.tanh %339 : vector<2x128xf32>
    %346 = vector.extract_strided_slice %344 {offsets = [0, 0], sizes = [2, 32], strides = [1, 1]} : vector<2x128xf32> to vector<2x32xf32>
    %347 = vector.extract_strided_slice %344 {offsets = [0, 32], sizes = [2, 32], strides = [1, 1]} : vector<2x128xf32> to vector<2x32xf32>
    %348 = vector.extract_strided_slice %345 {offsets = [0, 64], sizes = [2, 32], strides = [1, 1]} : vector<2x128xf32> to vector<2x32xf32>
    %349 = vector.extract_strided_slice %344 {offsets = [0, 96], sizes = [2, 32], strides = [1, 1]} : vector<2x128xf32> to vector<2x32xf32>
    %350 = arith.mulf %347, %334 : vector<2x32xf32>
    %351 = arith.mulf %346, %348 : vector<2x32xf32>
    %352 = arith.addf %350, %351 : vector<2x32xf32>
    %353 = math.tanh %352 : vector<2x32xf32>
    %354 = arith.mulf %349, %353 : vector<2x32xf32>
    %355 = vector.extract_strided_slice %244 {offsets = [12, 0], sizes = [2, 128], strides = [1, 1]} : vector<16x256xf32> to vector<2x128xf32>
    %cst_49 = arith.constant dense<0.000000e+00> : vector<2x128xf32>
    %356 = tpu.matmul %354, %6, %cst_49 {dimension_numbers = #tpu.dot_dimension_numbers<[1], [0], [0], [1], [0, 0, 1, 1], [], []>} : vector<2x32xf32>, vector<32x128xf32>, vector<2x128xf32> -> vector<2x128xf32>
    %357 = arith.addf %355, %356 : vector<2x128xf32>
    %358 = arith.negf %357 : vector<2x128xf32>
    %359 = math.exp %358 : vector<2x128xf32>
    %cst_50 = arith.constant 1.000000e+00 : f32
    %360 = vector.broadcast %cst_50 : f32 to vector<2x128xf32>
    %361 = arith.addf %360, %359 : vector<2x128xf32>
    %362 = arith.divf %360, %361 : vector<2x128xf32>
    %363 = math.tanh %357 : vector<2x128xf32>
    %364 = vector.extract_strided_slice %362 {offsets = [0, 0], sizes = [2, 32], strides = [1, 1]} : vector<2x128xf32> to vector<2x32xf32>
    %365 = vector.extract_strided_slice %362 {offsets = [0, 32], sizes = [2, 32], strides = [1, 1]} : vector<2x128xf32> to vector<2x32xf32>
    %366 = vector.extract_strided_slice %363 {offsets = [0, 64], sizes = [2, 32], strides = [1, 1]} : vector<2x128xf32> to vector<2x32xf32>
    %367 = vector.extract_strided_slice %362 {offsets = [0, 96], sizes = [2, 32], strides = [1, 1]} : vector<2x128xf32> to vector<2x32xf32>
    %368 = arith.mulf %365, %352 : vector<2x32xf32>
    %369 = arith.mulf %364, %366 : vector<2x32xf32>
    %370 = arith.addf %368, %369 : vector<2x32xf32>
    %371 = math.tanh %370 : vector<2x32xf32>
    %372 = arith.mulf %367, %371 : vector<2x32xf32>
    %373 = vector.extract_strided_slice %244 {offsets = [14, 0], sizes = [2, 128], strides = [1, 1]} : vector<16x256xf32> to vector<2x128xf32>
    %cst_51 = arith.constant dense<0.000000e+00> : vector<2x128xf32>
    %374 = tpu.matmul %372, %6, %cst_51 {dimension_numbers = #tpu.dot_dimension_numbers<[1], [0], [0], [1], [0, 0, 1, 1], [], []>} : vector<2x32xf32>, vector<32x128xf32>, vector<2x128xf32> -> vector<2x128xf32>
    %375 = arith.addf %373, %374 : vector<2x128xf32>
    %376 = arith.negf %375 : vector<2x128xf32>
    %377 = math.exp %376 : vector<2x128xf32>
    %cst_52 = arith.constant 1.000000e+00 : f32
    %378 = vector.broadcast %cst_52 : f32 to vector<2x128xf32>
    %379 = arith.addf %378, %377 : vector<2x128xf32>
    %380 = arith.divf %378, %379 : vector<2x128xf32>
    %381 = math.tanh %375 : vector<2x128xf32>
    %382 = vector.extract_strided_slice %380 {offsets = [0, 0], sizes = [2, 32], strides = [1, 1]} : vector<2x128xf32> to vector<2x32xf32>
    %383 = vector.extract_strided_slice %380 {offsets = [0, 32], sizes = [2, 32], strides = [1, 1]} : vector<2x128xf32> to vector<2x32xf32>
    %384 = vector.extract_strided_slice %381 {offsets = [0, 64], sizes = [2, 32], strides = [1, 1]} : vector<2x128xf32> to vector<2x32xf32>
    %385 = vector.extract_strided_slice %380 {offsets = [0, 96], sizes = [2, 32], strides = [1, 1]} : vector<2x128xf32> to vector<2x32xf32>
    %386 = arith.mulf %383, %370 : vector<2x32xf32>
    %387 = arith.mulf %382, %384 : vector<2x32xf32>
    %388 = arith.addf %386, %387 : vector<2x32xf32>
    %389 = math.tanh %388 : vector<2x32xf32>
    %390 = arith.mulf %385, %389 : vector<2x32xf32>
    %391 = vector.extract_strided_slice %244 {offsets = [14, 128], sizes = [2, 128], strides = [1, 1]} : vector<16x256xf32> to vector<2x128xf32>
    %cst_53 = arith.constant 0.000000e+00 : f32
    %392 = vector.broadcast %cst_53 : f32 to vector<2x32xf32>
    %393 = arith.negf %391 : vector<2x128xf32>
    %394 = math.exp %393 : vector<2x128xf32>
    %cst_54 = arith.constant 1.000000e+00 : f32
    %395 = vector.broadcast %cst_54 : f32 to vector<2x128xf32>
    %396 = arith.addf %395, %394 : vector<2x128xf32>
    %397 = arith.divf %395, %396 : vector<2x128xf32>
    %398 = math.tanh %391 : vector<2x128xf32>
    %399 = vector.extract_strided_slice %397 {offsets = [0, 0], sizes = [2, 32], strides = [1, 1]} : vector<2x128xf32> to vector<2x32xf32>
    %400 = vector.extract_strided_slice %397 {offsets = [0, 32], sizes = [2, 32], strides = [1, 1]} : vector<2x128xf32> to vector<2x32xf32>
    %401 = vector.extract_strided_slice %398 {offsets = [0, 64], sizes = [2, 32], strides = [1, 1]} : vector<2x128xf32> to vector<2x32xf32>
    %402 = vector.extract_strided_slice %397 {offsets = [0, 96], sizes = [2, 32], strides = [1, 1]} : vector<2x128xf32> to vector<2x32xf32>
    %403 = arith.mulf %400, %392 : vector<2x32xf32>
    %404 = arith.mulf %399, %401 : vector<2x32xf32>
    %405 = arith.addf %403, %404 : vector<2x32xf32>
    %406 = math.tanh %405 : vector<2x32xf32>
    %407 = arith.mulf %402, %406 : vector<2x32xf32>
    %408 = tpu.concatenate %390, %407 in 1 : vector<2x32xf32>, vector<2x32xf32> -> vector<2x64xf32>
    %c0_55 = arith.constant 0 : index
    %c0_56 = arith.constant 0 : index
    %409 = vector.load %arg7[%c0_55, %c0_56] : memref<64x16xf32, #tpu.memory_space<vmem>>, vector<64x16xf32>
    %cst_57 = arith.constant dense<0.000000e+00> : vector<2x16xf32>
    %410 = tpu.matmul %408, %409, %cst_57 {dimension_numbers = #tpu.dot_dimension_numbers<[1], [0], [0], [1], [0, 0, 1, 1], [], []>} : vector<2x64xf32>, vector<64x16xf32>, vector<2x16xf32> -> vector<2x16xf32>
    %c0_58 = arith.constant 0 : index
    %c0_59 = arith.constant 0 : index
    %411 = vector.load %arg8[%c0_58, %c0_59] : memref<1x16xf32, #tpu.memory_space<vmem>>, vector<1x16xf32>
    %412 = vector.broadcast %411 : vector<1x16xf32> to vector<2x16xf32>
    %413 = arith.addf %410, %412 : vector<2x16xf32>
    %414 = arith.negf %413 : vector<2x16xf32>
    %415 = math.exp %414 : vector<2x16xf32>
    %cst_60 = arith.constant 1.000000e+00 : f32
    %416 = vector.broadcast %cst_60 : f32 to vector<2x16xf32>
    %417 = arith.addf %416, %415 : vector<2x16xf32>
    %418 = arith.divf %416, %417 : vector<2x16xf32>
    %c0_61 = arith.constant 0 : index
    %c0_62 = arith.constant 0 : index
    %419 = vector.load %arg9[%c0_61, %c0_62] : memref<2x16xf32, #tpu.memory_space<vmem>>, vector<2x16xf32>
    tpu.vector_store %arg9[%c0_61, %c0_62], %418 {strides = array<i32>} : memref<2x16xf32, #tpu.memory_space<vmem>>, vector<2x16xf32>,
    return
  }
}

</mosaic_0001>

<bundles_post_ra>
// kernel: lstms_forward.1
= control target key start
LH: loop header
LB: loop body
LE: loop exit
PB: predicated region body
PF: predicated region fallthrough
CT: control target
= control target key end

     0   :  { %14 = vsyncpa [#allocation3], 0  ;;  %s3775_s0 = inlined_call_operand.vmem [shape: f32[16,32], index: 0, kind: input, shape index: {}]   ;;  %s3776_s1 = inlined_call_operand.hbm [shape: f32[32,256], index: 1, kind: input, shape index: {}]   ;;  %s3777_s2 = inlined_call_operand.vmem [shape: f32[1,256], index: 2, kind: input, shape index: {}]   ;;  %s3778_s3 = inlined_call_operand.hbm [shape: f32[64,128], index: 3, kind: input, shape index: {}]   ;;  %s3779_s4 = inlined_call_operand.vmem [shape: f32[64,256], index: 4, kind: input, shape index: {}]   ;;  %s3780_s5 = inlined_call_operand.vmem [shape: f32[1,256], index: 5, kind: input, shape index: {}]   ;;  %s3781_s6 = inlined_call_operand.hbm [shape: f32[32,128], index: 6, kind: input, shape index: {}]   ;;  %s3782_s7 = inlined_call_operand.vmem [shape: f32[64,16], index: 7, kind: input, shape index: {}]   ;;  %s3783_s8 = inlined_call_operand.vmem [shape: f32[1,16], index: 8, kind: input, shape index: {}]   ;;  %s3784_s9 = inlined_call_operand.hbm [shape: f32[2,16], index: 9, kind: output, shape index: {}]  }
   0x1   :  { %15 = vsyncpa [#allocation6], 0 }
   0x2   :  { %16 = vsyncpa [#allocation4], 0  ;;  %s3150_s30 = smov [#allocation5]   ;;  %s3056_s13 = scalar_lea.hbm %s3778_s3, 1024 }
   0x3   :  { %s38_s10 = sshll.u32 %s3150_s30, 4  ;;  %p3057_p0 = scmp.ne.s32.totalorder %s3778_s3, %s3056_s13  ;;  %s39_s10 = int_to_ptr.vmem [resolvable:$true] %s38_s10 }
   0x4   :  { %p3060_p1 = scmp.lt.u32.totalorder %s3056_s13, %s3778_s3 }
   0x6   :  { %p3062_p2 = pnand %p3060_p1, %p3057_p0 }
   0x8   :  { %3065 = shalt.err (!%p3062_p2)
}
   0x9   :  { %s3066_s18 = scalar_lea.vmem %s39_s10, 1024  ;;  %p3071_p4 = scmp.lt.s32.totalorder %s39_s10, %s39_s10 }
   0xa   :  { %p3067_p3 = scmp.ne.s32.totalorder %s39_s10, %s3066_s18  ;;  %p3072_p5 = scmp.lt.s32.totalorder %s3066_s18, %s3066_s18 }
   0xc   :  { %p3073_p6 = por %p3072_p5, %p3071_p4 }
   0xe   :  { %p3074_p7 = pnand %p3073_p6, %p3067_p3 }
  0x10   :  { %3077 = shalt.err (!%p3074_p7)
}
  0x11   :  { %s3151_s19 = smov 128   ;;  %s3152_s20 = smov 8  }
  0x12   :  { %44 = dma.hbm_to_vmem [thread:$0]  %s3778_s3, 1024, %s39_s10, [#allocation6], %s3151_s19, %s3151_s19, %s3152_s20  }
  0x13   :  { %s3153_s23 = smov [#allocation2]   ;;  %s3078_s27 = scalar_lea.hbm %s3776_s1, 1024 }
  0x14   :  { %s24_s24 = sshll.u32 %s3153_s23, 4  ;;  %p3079_p8 = scmp.ne.s32.totalorder %s3776_s1, %s3078_s27  ;;  %s25_s24 = int_to_ptr.vmem [resolvable:$true] %s24_s24 }
  0x15   :  { %p3082_p9 = scmp.lt.u32.totalorder %s3078_s27, %s3776_s1 }
  0x17   :  { %p3084_p10 = pnand %p3082_p9, %p3079_p8 }
  0x19   :  { %3087 = shalt.err (!%p3084_p10)
}
  0x1a   :  { %s3088_s12 = scalar_lea.vmem %s25_s24, 1024  ;;  %p3093_p12 = scmp.lt.s32.totalorder %s25_s24, %s25_s24 }
  0x1b   :  { %p3089_p11 = scmp.ne.s32.totalorder %s25_s24, %s3088_s12  ;;  %p3094_p13 = scmp.lt.s32.totalorder %s3088_s12, %s3088_s12 }
  0x1d   :  { %p3095_p0 = por %p3094_p13, %p3093_p12 }
  0x1f   :  { %p3096_p1 = pnand %p3095_p0, %p3089_p11 }
  0x21   :  { %3099 = shalt.err (!%p3096_p1)
}
  0x22   :  { %s3154_s3 = smov 256   ;;  %s3155_s10 = smov 16  }
  0x23   :  { %30 = dma.hbm_to_vmem [thread:$0]  %s3776_s1, 1024, %s25_s24, [#allocation3], %s3154_s3, %s3154_s3, %s3155_s10  }
  0x24   :  { %s3156_s15 = smov [#allocation7]   ;;  %s3100_s21 = scalar_lea.hbm %s3781_s6, 512 }
  0x25   :  { %s54_s16 = sshll.u32 %s3156_s15, 4  ;;  %p3101_p2 = scmp.ne.s32.totalorder %s3781_s6, %s3100_s21  ;;  %s55_s16 = int_to_ptr.vmem [resolvable:$true] %s54_s16 }
  0x26   :  { %p3104_p3 = scmp.lt.u32.totalorder %s3100_s21, %s3781_s6 }
  0x28   :  { %p3106_p4 = pnand %p3104_p3, %p3101_p2 }
  0x2a   :  { %3109 = shalt.err (!%p3106_p4)
}
  0x2b   :  { %s3110_s27 = scalar_lea.vmem %s55_s16, 512  ;;  %p3115_p6 = scmp.lt.s32.totalorder %s55_s16, %s55_s16 }
  0x2c   :  { %p3111_p5 = scmp.ne.s32.totalorder %s55_s16, %s3110_s27  ;;  %p3116_p7 = scmp.lt.s32.totalorder %s3110_s27, %s3110_s27 }
  0x2e   :  { %p3117_p8 = por %p3116_p7, %p3115_p6 }
  0x30   :  { %p3118_p9 = pnand %p3117_p8, %p3111_p5 }
  0x32   :  { %3121 = shalt.err (!%p3118_p9)
}
  0x33   :  { %60 = dma.hbm_to_vmem [thread:$0]  %s3781_s6, 512, %s55_s16, [#allocation6], %s3151_s19, %s3151_s19, %s3152_s20  }
  0x34   :  { %3144 = dma.done.wait [#allocation3], 1024  }
  0x35   :  { %3145 = vsyncadd [#allocation3], 4294966272  ;;  %vm209_vm0 = vcmask 1041408  }
  0x36   :  { %3146 = dma.done.wait [#allocation6], 1536  }
  0x37   :  { %3147 = vsyncadd [#allocation6], 4294965760  ;;  %v3157_v0 = vmov 0   ;;  %v3158_v1 = vmov 0.0   ;;  %v3159_v4 = vmov 0.0|0.0   ;;  %vm3160_vm1 = vmmov 0  }
  0x38   :  { %2915 = vset.pattern.permute.xlu0 %v3157_v0  ;;  %v210_v2 = vsel %vm209_vm0, 1.0, %v3158_v1  ;;  %196 = vmatprep.mubr.f32.mxu0 %v3158_v1  ;;  %v77_v5 = vld [vmem:[#allocation2 + $0x8] sm:$0xff]  ;;  %v79_v6 = vld [vmem:[#allocation2 + $0x18] sm:$0xff]  ;;  %v76_v7 = vld [vmem:[#allocation2] sm:$0xff]  ;;  %vm125_vm2 = vcmask 261120   ;;  %vm229_vm3 = vcmask 523264   ;;  %v115_v36 = vlaneseq }
  0x39   :  { %218 = vperm.xlu0 %2915, %v210_v2   ;;  %v211_v3 = vsub.f32 1.0, %v210_v2  ;;  %2729 = vmatprep.subr.bf16.mxu1 %v3159_v4  ;;  %v2721_v8 = vpack.c.bf16 %v79_v6, %v77_v5  ;;  %v78_v9 = vld [vmem:[#allocation2 + $0x10] sm:$0xff]  ;;  %v81_v10 = vld [vmem:[#allocation2 + $0x28] sm:$0xff]  ;;  %v83_v11 = vld [vmem:[#allocation2 + $0x38] sm:$0xff]  ;;  %s3162_s30 = smov 32   ;;  %vm1214_vm4 = vcmask 1043456  }
  0x3a   :  { %2478 = vmatprep.mubr.msk.f32.mxu1 %vm3160_vm1, %v3158_v1  ;;  %v2723_v12 = vpack.c.bf16 %v78_v9, %v76_v7  ;;  %v2725_v13 = vpack.c.bf16 %v83_v11, %v81_v10  ;;  %v80_v14 = vld [vmem:[#allocation2 + $0x20] sm:$0xff]  ;;  %v82_v15 = vld [vmem:[#allocation2 + $0x30] sm:$0xff]  ;;  %v86_v17 = vld [vmem:[#allocation5 + $0x8] sm:$0xff]  ;;  %v3316_v37 = vshrl.u32 %v115_v36, 7  ;;  %vm1216_vm5 = vcmask 1045504  }
  0x3b   :  { %2722 = vmatprep.subr.bf16.mxu0 %v2721_v8  ;;  %v85_v16 = vld [vmem:[#allocation5] sm:$0xff]  ;;  %v2727_v18 = vpack.c.bf16 %v82_v15, %v80_v14  ;;  %v87_v20 = vld [vmem:[#allocation5 + $0x10] sm:$0xff]  ;;  %v88_v21 = vld [vmem:[#allocation5 + $0x18] sm:$0xff]  ;;  %vm2284_vm6 = vcmask 123904  }
  0x3c   :  { %2724 = vmatpush1.bf16.msra.mxu0 %v2723_v12  ;;  %v3262_v19 = vpack.c.bf16 %v86_v17, %v85_v16  ;;  %v3265_v22 = vpack.c.bf16 %v88_v21, %v87_v20  ;;  %v89_v23 = vld [vmem:[#allocation5 + $0x20] sm:$0xff]  ;;  %v90_v24 = vld [vmem:[#allocation5 + $0x28] sm:$0xff]  ;;  %v91_v27 = vld [vmem:[#allocation5 + $0x30] sm:$0xff]  ;;  %v117_v38 = vsub.s32 0, %v3316_v37  ;;  %v121_v40 = vsub.s32 1, %v3316_v37 }
  0x3d   :  { %224 = vperm.xlu0 %2915, %v211_v3   ;;  %2726 = vmatprep.subr.bf16.mxu0 %v2725_v13  ;;  %v74_v25 = vld [vmem:[%s3775_s0] sm:$0xff]  ;;  %v3273_v26 = vpack.c.bf16 %v90_v24, %v89_v23  ;;  %v92_v28 = vld [vmem:[#allocation5 + $0x38] sm:$0xff]  ;;  %v75_v29 = vld [vmem:[%s3775_s0 + $0x8] sm:$0xff] }
  0x3e   :  { %2731 = vmatpush3.bf16.msra.mxu1 %v3262_v19  ;;  %v3284_v30 = vpack.c.bf16 %v92_v28, %v91_v27  ;;  %v84_v39 = vld [vmem:[%s3777_s2] sm:$0x3]  ;;  %s3161_s2 = smov 64  }
  0x3f   :  { %2732 = vmatprep.subr.bf16.mxu1 %v3159_v4  ;;  %v118_v41 = vrot.slane %v84_v39, %v117_v38  ;;  %v122_v43 = vrot.slane %v84_v39, %v121_v40 }
  0x40   :  { %2728 = vmatpush1.bf16.msra.mxu0 %v2727_v18 }
  0x41   :  { %2741 = vmatprep.subr.bf16.mxu0 %v3159_v4 }
  0x42   :  { %2734 = vmatpush3.bf16.msra.mxu1 %v3265_v22 }
  0x43   :  { %2302 = vmatmul.mubr.msk.f32.vlgmr.msra.gmra.mrb[0].mxu0 %vm125_vm2, %v74_v25  ;;  %2735 = vmatprep.subr.bf16.mxu1 %v3159_v4 }
  0x44   :  { %202 = vmatprep.mubr.f32.mxu0 %v3158_v1  ;;  %2743 = vmatpush3.bf16.msra.mxu0 %v3262_v19 }
  0x45   :  { %2744 = vmatprep.subr.bf16.mxu0 %v3159_v4 }
  0x46   :  { %2737 = vmatpush3.bf16.msra.mxu1 %v3273_v26 }
  0x47   :  { %2303 = vmatmul.mubr.msk.f32.gmra.mrb[2].mxu0 %vm125_vm2, %v75_v29  ;;  %2738 = vmatprep.subr.bf16.mxu1 %v3159_v4 }
  0x48   :  { %2746 = vmatpush3.bf16.msra.mxu0 %v3265_v22  ;;  %2497 = vmatprep.mubr.msk.f32.mxu0 %vm3160_vm1, %v3158_v1 }
  0x49   :  { %2747 = vmatprep.subr.bf16.mxu0 %v3159_v4 }
  0x4a   :  { %2740 = vmatpush3.bf16.msra.mxu1 %v3284_v30 }
  0x4b   :  { %2753 = vmatprep.subr.bf16.mxu1 %v3159_v4 }
  0x4c   :  { %2749 = vmatpush3.bf16.msra.mxu0 %v3273_v26 }
  0x4d   :  { %2750 = vmatprep.subr.bf16.mxu0 %v3159_v4 }
  0x50   :  { %2752 = vmatpush3.bf16.msra.mxu0 %v3284_v30 }
  0x51   :  { %2765 = vmatprep.subr.bf16.mxu0 %v3159_v4 }
  0xb8   :  { %v3298_v31 = vpop.permute.xlu0 %218 }
  0xb9   :  { %v221_v33 = vmul.f32 0.0, %v3298_v31 }
  0xbc   :  { %v3300_v32 = vpop.permute.xlu0 %224 }
  0xbd   :  { %v227_v34 = vmul.f32 0.0, %v3300_v32 }
  0xbf   :  { %v228_v35 = vsel %vm125_vm2, %v221_v33, %v227_v34 }
  0xc0   :  { %2479 = vmatmul.mubr.msk.f32.vlgmr.msra.gmra.mrb[0].mxu1 %vm229_vm3, %v228_v35 }
  0xc1   :  { %2755 = vmatpush3.bf16.msra.mxu1 %v3262_v19  ;;  %2516 = vmatprep.mubr.msk.f32.mxu1 %vm3160_vm1, %v3158_v1 }
  0xc2   :  { %2756 = vmatprep.subr.bf16.mxu1 %v3159_v4 }
  0xc5   :  { %2758 = vmatpush3.bf16.msra.mxu1 %v3265_v22 }
  0xc6   :  { %2759 = vmatprep.subr.bf16.mxu1 %v3159_v4 }
  0xc9   :  { %2761 = vmatpush3.bf16.msra.mxu1 %v3273_v26 }
  0xca   :  { %2762 = vmatprep.subr.bf16.mxu1 %v3159_v4 }
  0xcd   :  { %2764 = vmatpush3.bf16.msra.mxu1 %v3284_v30 }
  0xce   :  { %2777 = vmatprep.subr.bf16.mxu1 %v3159_v4 }
 0x116   :  { %v198_v42 = vpop.f32.mrb[0].mxu0 }
 0x117   :  { %v199_v44 = vadd.f32 %v198_v42, %v118_v41  ;;  %v200_v45 = vpop.f32.mrb[1].mxu0 }
 0x118   :  { %v201_v46 = vadd.f32 %v200_v45, %v122_v43 }
 0x119   :  { %v443_v48 = vrot.slane %v199_v44, 4  ;;  %v329_v55 = vrot.slane %v199_v44, 2  ;;  %v555_v56 = vrot.slane %v199_v44, 6 }
 0x11a   :  { %v204_v47 = vpop.f32.mrb[2].mxu0  ;;  %v670_v49 = vrot.slane %v201_v46, 4  ;;  %v785_v52 = vrot.slane %v201_v46, 2  ;;  %v1011_v53 = vrot.slane %v201_v46, 6 }
 0x11b   :  { %v205_v50 = vadd.f32 %v204_v47, %v118_v41  ;;  %v206_v51 = vpop.f32.mrb[3].mxu0 }
 0x11c   :  { %v207_v54 = vadd.f32 %v206_v51, %v122_v43 }
 0x11d   :  { %v3328_v57 = vsel %vm209_vm0, %v205_v50, %v670_v49  ;;  %v783_v58 = vrot.slane %v205_v50, 2  ;;  %v897_v59 = vrot.slane %v205_v50, 4  ;;  %v1009_v60 = vrot.slane %v205_v50, 6 }
 0x11e   :  { %v213_v61 = vrot.slane %v207_v54, 4  ;;  %v331_v62 = vrot.slane %v207_v54, 2  ;;  %v3331_v63 = vsel %vm209_vm0, %v443_v48, %v207_v54  ;;  %v557_v0 = vrot.slane %v207_v54, 6 }
 0x11f   :  { %v3334_v2 = vsel %vm209_vm0, %v783_v58, %v785_v52  ;;  %v3337_v3 = vsel %vm209_vm0, %v897_v59, %v201_v46  ;;  %v3340_v5 = vsel %vm209_vm0, %v1009_v60, %v1011_v53 }
 0x120   :  { %v215_v6 = vsel %vm209_vm0, %v199_v44, %v213_v61  ;;  %v333_v7 = vsel %vm209_vm0, %v329_v55, %v331_v62  ;;  %v3345_v8 = vsel %vm209_vm0, %v555_v56, %v557_v0 }
 0x193   :  { %v299_v9 = vpop.f32.mrb[0].mxu1 }
 0x194   :  { %v303_v10 = vadd.f32 %v299_v9, %v215_v6  ;;  %v2480_v11 = vpop.f32.mrb[1].mxu1 }
 0x196   :  { %2916 = vtanh.f32 %v303_v10  ;;  %v2305_v13 = vmul.f32 -1.442695, %v303_v10 }
 0x198   :  { %2918 = vpow2.f32 %v2305_v13 }
 0x1a0   :  { %v2917_v12 = vpop.eup %2916 }
 0x1a1   :  { %313 = vrot.lane.b32.xlu1 %v2917_v12, %s3161_s2 }
 0x1a2   :  { %v2919_v14 = vpop.eup %2918 }
 0x1a3   :  { %v307_v15 = vadd.f32 1.0, %v2919_v14 }
 0x1a5   :  { %2920 = vrcp.f32 %v307_v15 }
 0x1af   :  { %v2921_v16 = vpop.eup %2920 }
 0x1b0   :  { %v311_v20 = vmul.f32 0.0, %v2921_v16 }
 0x213   :  { %v314_v17 = vpop.permute.xlu1 %313 }
 0x214   :  { %v316_v18 = vmul.f32 %v2921_v16, %v314_v17 }
 0x216   :  { %318 = vrot.lane.b32.xlu1 %v316_v18, %s3162_s30 }
 0x288   :  { %v319_v21 = vpop.permute.xlu1 %318 }
 0x289   :  { %v321_v23 = vadd.f32 %v319_v21, %v311_v20 }
 0x28b   :  { %2922 = vtanh.f32 %v321_v23 }
 0x295   :  { %v2923_v24 = vpop.eup %2922 }
 0x296   :  { %324 = vrot.lane.b32.xlu0 %v2923_v24, %s3161_s2 }
 0x308   :  { %v325_v25 = vpop.permute.xlu0 %324 }
 0x309   :  { %v3350_v27 = vmul.f32 %v2921_v16, %v325_v25 }
 0x30b   :  { %v335_v28 = vmul.f32 %v3350_v27, %v3300_v32  ;;  %v334_v29 = vmul.f32 %v3350_v27, %v3298_v31 }
 0x30d   :  { %341 = vrot.lane.b32.xlu0 %v335_v28, %s3161_s2  ;;  %337 = vrot.lane.b32.xlu1 %v334_v29, %s3162_s30 }
 0x37f   :  { %v342_v33 = vpop.permute.xlu0 %341  ;;  %v338_v34 = vpop.permute.xlu1 %337 }
 0x380   :  { %v344_v35 = vsel %vm125_vm2, %v338_v34, %v342_v33 }
 0x381   :  { %2498 = vmatmul.mubr.msk.f32.vlgmr.msra.gmra.mrb[4].mxu0 %vm229_vm3, %v344_v35 }
 0x382   :  { %2767 = vmatpush3.bf16.msra.mxu0 %v3262_v19  ;;  %2535 = vmatprep.mubr.msk.f32.mxu0 %vm3160_vm1, %v3158_v1 }
 0x383   :  { %2768 = vmatprep.subr.bf16.mxu0 %v3159_v4 }
 0x386   :  { %2770 = vmatpush3.bf16.msra.mxu0 %v3265_v22 }
 0x387   :  { %2771 = vmatprep.subr.bf16.mxu0 %v3159_v4 }
 0x38a   :  { %2773 = vmatpush3.bf16.msra.mxu0 %v3273_v26 }
 0x38b   :  { %2774 = vmatprep.subr.bf16.mxu0 %v3159_v4 }
 0x38e   :  { %2776 = vmatpush3.bf16.msra.mxu0 %v3284_v30 }
 0x38f   :  { %2789 = vmatprep.subr.bf16.mxu0 %v3159_v4 }
 0x454   :  { %v414_v36 = vpop.f32.mrb[4].mxu0 }
 0x455   :  { %v418_v39 = vadd.f32 %v414_v36, %v333_v7  ;;  %v2499_v41 = vpop.f32.mrb[5].mxu0 }
 0x457   :  { %2924 = vtanh.f32 %v418_v39  ;;  %v2307_v43 = vmul.f32 -1.442695, %v418_v39 }
 0x459   :  { %2926 = vpow2.f32 %v2307_v43 }
 0x461   :  { %v2925_v42 = vpop.eup %2924 }
 0x462   :  { %428 = vrot.lane.b32.xlu1 %v2925_v42, %s3161_s2 }
 0x463   :  { %v2927_v44 = vpop.eup %2926 }
 0x464   :  { %v422_v45 = vadd.f32 1.0, %v2927_v44 }
 0x466   :  { %2928 = vrcp.f32 %v422_v45 }
 0x470   :  { %v2929_v46 = vpop.eup %2928 }
 0x471   :  { %v426_v49 = vmul.f32 %v2929_v46, %v321_v23 }
 0x4d4   :  { %v429_v47 = vpop.permute.xlu1 %428 }
 0x4d5   :  { %v431_v48 = vmul.f32 %v2929_v46, %v429_v47 }
 0x4d7   :  { %433 = vrot.lane.b32.xlu0 %v431_v48, %s3162_s30 }
 0x549   :  { %v434_v50 = vpop.permute.xlu0 %433 }
 0x54a   :  { %v436_v51 = vadd.f32 %v434_v50, %v426_v49 }
 0x54c   :  { %2930 = vtanh.f32 %v436_v51 }
 0x556   :  { %v2931_v52 = vpop.eup %2930 }
 0x557   :  { %439 = vrot.lane.b32.xlu1 %v2931_v52, %s3161_s2 }
 0x5c9   :  { %v440_v53 = vpop.permute.xlu1 %439 }
 0x5ca   :  { %v3373_v54 = vmul.f32 %v2929_v46, %v440_v53 }
 0x5cc   :  { %v447_v55 = vmul.f32 %v3373_v54, %v3300_v32  ;;  %v446_v56 = vmul.f32 %v3373_v54, %v3298_v31 }
 0x5ce   :  { %453 = vrot.lane.b32.xlu1 %v447_v55, %s3161_s2  ;;  %449 = vrot.lane.b32.xlu0 %v446_v56, %s3162_s30 }
 0x640   :  { %v454_v58 = vpop.permute.xlu1 %453  ;;  %v450_v59 = vpop.permute.xlu0 %449 }
 0x641   :  { %v456_v60 = vsel %vm125_vm2, %v450_v59, %v454_v58 }
 0x642   :  { %2517 = vmatmul.mubr.msk.f32.vlgmr.msra.gmra.mrb[2].mxu1 %vm229_vm3, %v456_v60 }
 0x643   :  { %2779 = vmatpush3.bf16.msra.mxu1 %v3262_v19  ;;  %2554 = vmatprep.mubr.msk.f32.mxu1 %vm3160_vm1, %v3158_v1 }
 0x644   :  { %2780 = vmatprep.subr.bf16.mxu1 %v3159_v4 }
 0x647   :  { %2782 = vmatpush3.bf16.msra.mxu1 %v3265_v22 }
 0x648   :  { %2783 = vmatprep.subr.bf16.mxu1 %v3159_v4 }
 0x64b   :  { %2785 = vmatpush3.bf16.msra.mxu1 %v3273_v26 }
 0x64c   :  { %2786 = vmatprep.subr.bf16.mxu1 %v3159_v4 }
 0x64f   :  { %2788 = vmatpush3.bf16.msra.mxu1 %v3284_v30 }
 0x650   :  { %2801 = vmatprep.subr.bf16.mxu1 %v3159_v4 }
 0x715   :  { %v526_v61 = vpop.f32.mrb[2].mxu1 }
 0x716   :  { %v530_v62 = vadd.f32 %v526_v61, %v3331_v63  ;;  %v2518_v0 = vpop.f32.mrb[3].mxu1 }
 0x718   :  { %2932 = vtanh.f32 %v530_v62  ;;  %v2309_v7 = vmul.f32 -1.442695, %v530_v62 }
 0x71a   :  { %2934 = vpow2.f32 %v2309_v7 }
 0x722   :  { %v2933_v6 = vpop.eup %2932 }
 0x723   :  { %540 = vrot.lane.b32.xlu0 %v2933_v6, %s3161_s2 }
 0x724   :  { %v2935_v9 = vpop.eup %2934 }
 0x725   :  { %v534_v10 = vadd.f32 1.0, %v2935_v9 }
 0x727   :  { %2936 = vrcp.f32 %v534_v10 }
 0x731   :  { %v2937_v11 = vpop.eup %2936 }
 0x732   :  { %v538_v14 = vmul.f32 %v2937_v11, %v436_v51 }
 0x795   :  { %v541_v12 = vpop.permute.xlu0 %540 }
 0x796   :  { %v543_v13 = vmul.f32 %v2937_v11, %v541_v12 }
 0x798   :  { %545 = vrot.lane.b32.xlu1 %v543_v13, %s3162_s30 }
 0x80a   :  { %v546_v15 = vpop.permute.xlu1 %545 }
 0x80b   :  { %v548_v16 = vadd.f32 %v546_v15, %v538_v14 }
 0x80d   :  { %2938 = vtanh.f32 %v548_v16 }
 0x817   :  { %v2939_v63 = vpop.eup %2938 }
 0x818   :  { %551 = vrot.lane.b32.xlu0 %v2939_v63, %s3161_s2 }
 0x88a   :  { %v552_v17 = vpop.permute.xlu0 %551 }
 0x88b   :  { %v3397_v18 = vmul.f32 %v2937_v11, %v552_v17 }
 0x88d   :  { %v561_v20 = vmul.f32 %v3397_v18, %v3300_v32  ;;  %v560_v21 = vmul.f32 %v3397_v18, %v3298_v31 }
 0x88f   :  { %567 = vrot.lane.b32.xlu0 %v561_v20, %s3161_s2  ;;  %563 = vrot.lane.b32.xlu1 %v560_v21, %s3162_s30 }
 0x901   :  { %v568_v23 = vpop.permute.xlu0 %567  ;;  %v564_v24 = vpop.permute.xlu1 %563 }
 0x902   :  { %v570_v25 = vsel %vm125_vm2, %v564_v24, %v568_v23 }
 0x903   :  { %2536 = vmatmul.mubr.msk.f32.vlgmr.msra.gmra.mrb[6].mxu0 %vm229_vm3, %v570_v25 }
 0x904   :  { %2791 = vmatpush3.bf16.msra.mxu0 %v3262_v19  ;;  %2573 = vmatprep.mubr.msk.f32.mxu0 %vm3160_vm1, %v3158_v1 }
 0x905   :  { %2792 = vmatprep.subr.bf16.mxu0 %v3159_v4 }
 0x908   :  { %2794 = vmatpush3.bf16.msra.mxu0 %v3265_v22 }
 0x909   :  { %2795 = vmatprep.subr.bf16.mxu0 %v3159_v4 }
 0x90c   :  { %2797 = vmatpush3.bf16.msra.mxu0 %v3273_v26 }
 0x90d   :  { %2798 = vmatprep.subr.bf16.mxu0 %v3159_v4 }
 0x910   :  { %2800 = vmatpush3.bf16.msra.mxu0 %v3284_v30 }
 0x911   :  { %2813 = vmatprep.subr.bf16.mxu0 %v3159_v4 }
 0x9d6   :  { %v640_v28 = vpop.f32.mrb[6].mxu0 }
 0x9d7   :  { %v644_v29 = vadd.f32 %v640_v28, %v3345_v8  ;;  %v2537_v33 = vpop.f32.mrb[7].mxu0 }
 0x9d9   :  { %2940 = vtanh.f32 %v644_v29  ;;  %v2311_v35 = vmul.f32 -1.442695, %v644_v29 }
 0x9db   :  { %2942 = vpow2.f32 %v2311_v35 }
 0x9e3   :  { %v2941_v34 = vpop.eup %2940 }
 0x9e4   :  { %654 = vrot.lane.b32.xlu1 %v2941_v34, %s3161_s2 }
 0x9e5   :  { %v2943_v36 = vpop.eup %2942 }
 0x9e6   :  { %v648_v39 = vadd.f32 1.0, %v2943_v36 }
 0x9e8   :  { %2944 = vrcp.f32 %v648_v39 }
 0x9f2   :  { %v2945_v41 = vpop.eup %2944 }
 0x9f3   :  { %v652_v44 = vmul.f32 %v2945_v41, %v548_v16 }
 0xa56   :  { %v655_v42 = vpop.permute.xlu1 %654 }
 0xa57   :  { %v657_v43 = vmul.f32 %v2945_v41, %v655_v42 }
 0xa59   :  { %659 = vrot.lane.b32.xlu0 %v657_v43, %s3162_s30 }
 0xacb   :  { %v660_v45 = vpop.permute.xlu0 %659 }
 0xacc   :  { %v662_v46 = vadd.f32 %v660_v45, %v652_v44 }
 0xace   :  { %2946 = vtanh.f32 %v662_v46 }
 0xad8   :  { %v2947_v8 = vpop.eup %2946 }
 0xad9   :  { %665 = vrot.lane.b32.xlu1 %v2947_v8, %s3161_s2 }
 0xb4b   :  { %v666_v47 = vpop.permute.xlu1 %665 }
 0xb4c   :  { %v3421_v48 = vmul.f32 %v2945_v41, %v666_v47 }
 0xb4e   :  { %v674_v49 = vmul.f32 %v3421_v48, %v3300_v32  ;;  %v673_v50 = vmul.f32 %v3421_v48, %v3298_v31 }
 0xb50   :  { %680 = vrot.lane.b32.xlu1 %v674_v49, %s3161_s2  ;;  %676 = vrot.lane.b32.xlu0 %v673_v50, %s3162_s30 }
 0xbc2   :  { %v681_v51 = vpop.permute.xlu1 %680  ;;  %v677_v52 = vpop.permute.xlu0 %676 }
 0xbc3   :  { %v683_v53 = vsel %vm125_vm2, %v677_v52, %v681_v51 }
 0xbc4   :  { %2555 = vmatmul.mubr.msk.f32.vlgmr.msra.gmra.mrb[4].mxu1 %vm229_vm3, %v683_v53 }
 0xbc5   :  { %2803 = vmatpush3.bf16.msra.mxu1 %v3262_v19  ;;  %2592 = vmatprep.mubr.msk.f32.mxu1 %vm3160_vm1, %v3158_v1 }
 0xbc6   :  { %2804 = vmatprep.subr.bf16.mxu1 %v3159_v4 }
 0xbc9   :  { %2806 = vmatpush3.bf16.msra.mxu1 %v3265_v22 }
 0xbca   :  { %2807 = vmatprep.subr.bf16.mxu1 %v3159_v4 }
 0xbcd   :  { %2809 = vmatpush3.bf16.msra.mxu1 %v3273_v26 }
 0xbce   :  { %2810 = vmatprep.subr.bf16.mxu1 %v3159_v4 }
 0xbd1   :  { %2812 = vmatpush3.bf16.msra.mxu1 %v3284_v30 }
 0xc97   :  { %v753_v55 = vpop.f32.mrb[4].mxu1 }
 0xc98   :  { %v757_v56 = vadd.f32 %v753_v55, %v3328_v57  ;;  %v2556_v58 = vpop.f32.mrb[5].mxu1 }
 0xc9a   :  { %2948 = vtanh.f32 %v757_v56  ;;  %v2313_v60 = vmul.f32 -1.442695, %v757_v56 }
 0xc9c   :  { %2950 = vpow2.f32 %v2313_v60 }
 0xca4   :  { %v2949_v59 = vpop.eup %2948 }
 0xca5   :  { %767 = vrot.lane.b32.xlu0 %v2949_v59, %s3161_s2 }
 0xca6   :  { %v2951_v61 = vpop.eup %2950 }
 0xca7   :  { %v761_v62 = vadd.f32 1.0, %v2951_v61 }
 0xca9   :  { %2952 = vrcp.f32 %v761_v62 }
 0xcb3   :  { %v2953_v0 = vpop.eup %2952 }
 0xcb4   :  { %v765_v9 = vmul.f32 %v2953_v0, %v662_v46 }
 0xd17   :  { %v768_v6 = vpop.permute.xlu0 %767 }
 0xd18   :  { %v770_v7 = vmul.f32 %v2953_v0, %v768_v6 }
 0xd1a   :  { %772 = vrot.lane.b32.xlu1 %v770_v7, %s3162_s30 }
 0xd8c   :  { %v773_v10 = vpop.permute.xlu1 %772 }
 0xd8d   :  { %v775_v11 = vadd.f32 %v773_v10, %v765_v9 }
 0xd8f   :  { %2954 = vtanh.f32 %v775_v11 }
 0xd99   :  { %v2955_v57 = vpop.eup %2954 }
 0xd9a   :  { %778 = vrot.lane.b32.xlu0 %v2955_v57, %s3161_s2 }
 0xe0c   :  { %v779_v12 = vpop.permute.xlu0 %778 }
 0xe0d   :  { %v3444_v13 = vmul.f32 %v2953_v0, %v779_v12 }
 0xe0f   :  { %v789_v14 = vmul.f32 %v3444_v13, %v3300_v32  ;;  %v788_v15 = vmul.f32 %v3444_v13, %v3298_v31 }
 0xe11   :  { %795 = vrot.lane.b32.xlu0 %v789_v14, %s3161_s2  ;;  %791 = vrot.lane.b32.xlu1 %v788_v15, %s3162_s30 }
 0xe83   :  { %v796_v16 = vpop.permute.xlu0 %795  ;;  %v792_v63 = vpop.permute.xlu1 %791 }
 0xe84   :  { %v798_v17 = vsel %vm125_vm2, %v792_v63, %v796_v16 }
 0xe85   :  { %2574 = vmatmul.mubr.msk.f32.vlgmr.msra.gmra.mrb[8].mxu0 %vm229_vm3, %v798_v17 }
 0xe86   :  { %2815 = vmatpush3.bf16.msra.mxu0 %v3262_v19  ;;  %2611 = vmatprep.mubr.msk.f32.mxu0 %vm3160_vm1, %v3158_v1 }
 0xe87   :  { %2816 = vmatprep.subr.bf16.mxu0 %v3159_v4 }
 0xe8a   :  { %2818 = vmatpush3.bf16.msra.mxu0 %v3265_v22 }
 0xe8b   :  { %2819 = vmatprep.subr.bf16.mxu0 %v3159_v4 }
 0xe8e   :  { %2821 = vmatpush3.bf16.msra.mxu0 %v3273_v26 }
 0xe8f   :  { %2822 = vmatprep.subr.bf16.mxu0 %v3159_v4 }
 0xe92   :  { %2824 = vmatpush3.bf16.msra.mxu0 %v3284_v30 }
 0xe93   :  { %2841 = vmatprep.subr.bf16.mxu0 %v3159_v4 }
 0xf58   :  { %v868_v20 = vpop.f32.mrb[8].mxu0 }
 0xf59   :  { %v872_v19 = vadd.f32 %v868_v20, %v3334_v2  ;;  %v2575_v21 = vpop.f32.mrb[9].mxu0 }
 0xf5a   :  { %v96_v21 = vld [vmem:[%s3779_s4 + $0x18] sm:$0xff] }
 0xf5b   :  { %2956 = vtanh.f32 %v872_v19  ;;  %v2315_v24 = vmul.f32 -1.442695, %v872_v19  ;;  %v94_v19 = vld [vmem:[%s3779_s4 + $0x8] sm:$0xff] }
 0xf5d   :  { %2958 = vpow2.f32 %v2315_v24  ;;  %v2825_v24 = vpack.c.bf16 %v96_v21, %v94_v19 }
 0xf5f   :  { %2826 = vmatprep.subr.bf16.mxu1 %v2825_v24 }
 0xf65   :  { %v2957_v23 = vpop.eup %2956 }
 0xf66   :  { %882 = vrot.lane.b32.xlu1 %v2957_v23, %s3161_s2  ;;  %v93_v23 = vld [vmem:[%s3779_s4] sm:$0xff] }
 0xf67   :  { %v2959_v22 = vpop.eup %2958 }
 0xf68   :  { %v876_v25 = vadd.f32 1.0, %v2959_v22  ;;  %v95_v22 = vld [vmem:[%s3779_s4 + $0x10] sm:$0xff] }
 0xf6a   :  { %2960 = vrcp.f32 %v876_v25  ;;  %v98_v25 = vld [vmem:[%s3779_s4 + $0x28] sm:$0xff] }
 0xf74   :  { %v2961_v26 = vpop.eup %2960 }
 0xf75   :  { %v880_v30 = vmul.f32 %v2961_v26, %v775_v11 }
 0xfd8   :  { %v883_v28 = vpop.permute.xlu1 %882 }
 0xfd9   :  { %v885_v29 = vmul.f32 %v2961_v26, %v883_v28  ;;  %v2827_v28 = vpack.c.bf16 %v95_v22, %v93_v23 }
 0xfdb   :  { %887 = vrot.lane.b32.xlu0 %v885_v29, %s3162_s30 }
0x104d   :  { %v888_v33 = vpop.permute.xlu0 %887 }
0x104e   :  { %v890_v34 = vadd.f32 %v888_v33, %v880_v30  ;;  %v97_v30 = vld [vmem:[%s3779_s4 + $0x20] sm:$0xff]  ;;  %v99_v33 = vld [vmem:[%s3779_s4 + $0x30] sm:$0xff] }
0x1050   :  { %2962 = vtanh.f32 %v890_v34 }
0x105a   :  { %v2963_v2 = vpop.eup %2962 }
0x105b   :  { %893 = vrot.lane.b32.xlu1 %v2963_v2, %s3161_s2  ;;  %v2831_v2 = vpack.c.bf16 %v99_v33, %v97_v30 }
0x10cd   :  { %v894_v35 = vpop.permute.xlu1 %893 }
0x10ce   :  { %v3468_v36 = vmul.f32 %v2961_v26, %v894_v35  ;;  %v100_v26 = vld [vmem:[%s3779_s4 + $0x38] sm:$0xff] }
0x10cf   :  { %v2829_v29 = vpack.c.bf16 %v100_v26, %v98_v25  ;;  %v3597_v25 = vld [vmem:[%s3780_s5] sm:$0x3] }
0x10d0   :  { %v901_v39 = vmul.f32 %v3468_v36, %v3300_v32  ;;  %v900_v41 = vmul.f32 %v3468_v36, %v3298_v31  ;;  %v3602_v26 = vrot.slane %v3597_v25, %v117_v38 }
0x10d2   :  { %907 = vrot.lane.b32.xlu1 %v901_v39, %s3161_s2  ;;  %903 = vrot.lane.b32.xlu0 %v900_v41, %s3162_s30  ;;  %v1148_v39 = vrot.slane %v3468_v36, 2  ;;  %v102_v41 = vld [vmem:[%s3779_s4 + $0x48] sm:$0xff] }
0x1144   :  { %v908_v42 = vpop.permute.xlu1 %907  ;;  %v904_v43 = vpop.permute.xlu0 %903 }
0x1145   :  { %v910_v44 = vsel %vm125_vm2, %v904_v43, %v908_v42  ;;  %v104_v42 = vld [vmem:[%s3779_s4 + $0x58] sm:$0xff] }
0x1146   :  { %2593 = vmatmul.mubr.msk.f32.vlgmr.msra.gmra.mrb[6].mxu1 %vm229_vm3, %v910_v44  ;;  %v2833_v43 = vpack.c.bf16 %v104_v42, %v102_v41  ;;  %v101_v44 = vld [vmem:[%s3779_s4 + $0x40] sm:$0xff] }
0x1147   :  { %1302 = vmatprep.mubr.f32.mxu1 %v3158_v1  ;;  %2828 = vmatpush1.bf16.msra.mxu1 %v2827_v28 }
0x1148   :  { %2830 = vmatprep.subr.bf16.mxu1 %v2829_v29 }
0x114b   :  { %2832 = vmatpush1.bf16.msra.mxu1 %v2831_v2 }
0x114c   :  { %2834 = vmatprep.subr.bf16.mxu1 %v2833_v43 }
0x1219   :  { %v980_v45 = vpop.f32.mrb[6].mxu1 }
0x121a   :  { %v984_v46 = vadd.f32 %v980_v45, %v3337_v3  ;;  %v2594_v8 = vpop.f32.mrb[7].mxu1  ;;  %v103_v45 = vld [vmem:[%s3779_s4 + $0x50] sm:$0xff] }
0x121b   :  { %v110_v8 = vld [vmem:[#allocation7] sm:$0xff] }
0x121c   :  { %2964 = vtanh.f32 %v984_v46  ;;  %v2317_v49 = vmul.f32 -1.442695, %v984_v46  ;;  %v2835_v46 = vpack.c.bf16 %v103_v45, %v101_v44 }
0x121e   :  { %2966 = vpow2.f32 %v2317_v49  ;;  %2836 = vmatpush1.bf16.msra.mxu1 %v2835_v46 }
0x1226   :  { %v2965_v47 = vpop.eup %2964 }
0x1227   :  { %994 = vrot.lane.b32.xlu0 %v2965_v47, %s3161_s2  ;;  %v111_v47 = vld [vmem:[#allocation7 + $0x8] sm:$0xff] }
0x1228   :  { %v2967_v50 = vpop.eup %2966  ;;  %v3547_v49 = vpack.c.bf16 %v111_v47, %v110_v8 }
0x1229   :  { %v988_v51 = vadd.f32 1.0, %v2967_v50  ;;  %v106_v50 = vld [vmem:[%s3779_s4 + $0x68] sm:$0xff] }
0x122b   :  { %2968 = vrcp.f32 %v988_v51  ;;  %v108_v51 = vld [vmem:[%s3779_s4 + $0x78] sm:$0xff] }
0x1235   :  { %v2969_v52 = vpop.eup %2968 }
0x1236   :  { %v992_v56 = vmul.f32 %v2969_v52, %v890_v34 }
0x1299   :  { %v995_v53 = vpop.permute.xlu0 %994 }
0x129a   :  { %v997_v55 = vmul.f32 %v2969_v52, %v995_v53  ;;  %v105_v53 = vld [vmem:[%s3779_s4 + $0x60] sm:$0xff] }
0x129c   :  { %999 = vrot.lane.b32.xlu1 %v997_v55, %s3162_s30  ;;  %v107_v55 = vld [vmem:[%s3779_s4 + $0x70] sm:$0xff] }
0x130e   :  { %v1000_v58 = vpop.permute.xlu1 %999 }
0x130f   :  { %v1002_v59 = vadd.f32 %v1000_v58, %v992_v56  ;;  %v2839_v56 = vpack.c.bf16 %v107_v55, %v105_v53  ;;  %v112_v58 = vld [vmem:[#allocation7 + $0x10] sm:$0xff] }
0x1311   :  { %2970 = vtanh.f32 %v1002_v59 }
0x131b   :  { %v2971_v3 = vpop.eup %2970 }
0x131c   :  { %1005 = vrot.lane.b32.xlu0 %v2971_v3, %s3161_s2 }
0x138e   :  { %v1006_v60 = vpop.permute.xlu0 %1005 }
0x138f   :  { %v3483_v61 = vmul.f32 %v2969_v52, %v1006_v60  ;;  %v2837_v52 = vpack.c.bf16 %v108_v51, %v106_v50 }
0x1391   :  { %v1015_v62 = vmul.f32 %v3483_v61, %v3300_v32  ;;  %v1014_v0 = vmul.f32 %v3483_v61, %v3298_v31  ;;  %v1138_v35 = vrot.slane %v3483_v61, 2  ;;  %2838 = vmatprep.subr.bf16.mxu1 %v2837_v52 }
0x1392   :  { %2840 = vmatpush1.bf16.msra.mxu1 %v2839_v56 }
0x1393   :  { %1021 = vrot.lane.b32.xlu0 %v1015_v62, %s3161_s2  ;;  %1017 = vrot.lane.b32.xlu1 %v1014_v0, %s3162_s30 }
0x1394   :  { %2853 = vmatprep.subr.bf16.mxu1 %v3159_v4 }
0x1405   :  { %v1022_v6 = vpop.permute.xlu0 %1021  ;;  %v1018_v7 = vpop.permute.xlu1 %1017 }
0x1406   :  { %v1024_v9 = vsel %vm125_vm2, %v1018_v7, %v1022_v6  ;;  %v1158_v6 = vrot.slane %v3444_v13, 2 }
0x1407   :  { %2612 = vmatmul.mubr.msk.f32.vlgmr.msra.gmra.mrb[10].mxu0 %vm229_vm3, %v1024_v9 }
0x1408   :  { %2622 = vmatprep.mubr.msk.f32.mxu0 %vm3160_vm1, %v3158_v1  ;;  %2843 = vmatpush3.bf16.msra.mxu0 %v3547_v49 }
0x1409   :  { %2844 = vmatprep.subr.bf16.mxu0 %v3159_v4 }
0x14da   :  { %v1094_v10 = vpop.f32.mrb[10].mxu0 }
0x14db   :  { %v1098_v11 = vadd.f32 %v1094_v10, %v3340_v5  ;;  %v2613_v32 = vpop.f32.mrb[11].mxu0 }
0x14dd   :  { %2972 = vtanh.f32 %v1098_v11  ;;  %v2319_v31 = vmul.f32 -1.442695, %v1098_v11 }
0x14df   :  { %2974 = vpow2.f32 %v2319_v31 }
0x14e7   :  { %v2973_v57 = vpop.eup %2972 }
0x14e8   :  { %1108 = vrot.lane.b32.xlu1 %v2973_v57, %s3161_s2 }
0x14e9   :  { %v2975_v12 = vpop.eup %2974 }
0x14ea   :  { %v1102_v14 = vadd.f32 1.0, %v2975_v12 }
0x14ec   :  { %2976 = vrcp.f32 %v1102_v14 }
0x14f6   :  { %v2977_v15 = vpop.eup %2976 }
0x14f7   :  { %v1106_v5 = vmul.f32 %v2977_v15, %v1002_v59  ;;  %v113_v59 = vld [vmem:[#allocation7 + $0x18] sm:$0xff] }
0x14f8   :  { %v3563_v3 = vpack.c.bf16 %v113_v59, %v112_v58 }
0x14fa   :  { %2846 = vmatpush3.bf16.msra.mxu0 %v3563_v3 }
0x14fb   :  { %2847 = vmatprep.subr.bf16.mxu0 %v3159_v4 }
0x14fd   :  { %2623 = vmatmul.mubr.f32.vlgmr.msra.gmra.mrb[12].mxu0 %v3158_v1 }
0x14fe   :  { %2849 = vmatpush3.bf16.msra.mxu0 %v3547_v49  ;;  %2633 = vmatprep.mubr.msk.f32.mxu0 %vm3160_vm1, %v3158_v1 }
0x14ff   :  { %2850 = vmatprep.subr.bf16.mxu0 %v3159_v4 }
0x1502   :  { %2852 = vmatpush3.bf16.msra.mxu0 %v3563_v3 }
0x1503   :  { %2859 = vmatprep.subr.bf16.mxu0 %v3159_v4 }
0x155a   :  { %v1109_v16 = vpop.permute.xlu1 %1108 }
0x155b   :  { %v1111_v63 = vmul.f32 %v2977_v15, %v1109_v16 }
0x155d   :  { %1113 = vrot.lane.b32.xlu0 %v1111_v63, %s3162_s30 }
0x1561   :  { %1134 = vrot.lane.b32.xlu0 %v3373_v54, %s3162_s30 }
0x1565   :  { %1144 = vrot.lane.b32.xlu0 %v3397_v18, %s3162_s30 }
0x1569   :  { %1124 = vrot.lane.b32.xlu0 %v3350_v27, %s3162_s30 }
0x156d   :  { %1154 = vrot.lane.b32.xlu0 %v3421_v48, %s3162_s30 }
0x15cf   :  { %v1114_v17 = vpop.permute.xlu0 %1113 }
0x15d0   :  { %v1116_v20 = vadd.f32 %v1114_v17, %v1106_v5  ;;  %v1383_v24 = vpop.f32.mrb[12].mxu0 }
0x15d1   :  { %v2624_v22 = vpop.f32.mrb[13].mxu0 }
0x15d2   :  { %2978 = vtanh.f32 %v1116_v20 }
0x15d3   :  { %v1135_v7 = vpop.permute.xlu0 %1134 }
0x15d7   :  { %v1145_v10 = vpop.permute.xlu0 %1144 }
0x15db   :  { %v1125_v32 = vpop.permute.xlu0 %1124 }
0x15dc   :  { %v2979_v34 = vpop.eup %2978 }
0x15dd   :  { %1119 = vrot.lane.b32.xlu1 %v2979_v34, %s3161_s2 }
0x15df   :  { %v1155_v16 = vpop.permute.xlu0 %1154 }
0x15e1   :  { %1139 = vrot.lane.b32.xlu1 %v1138_v35, %s3161_s2 }
0x15e5   :  { %1149 = vrot.lane.b32.xlu1 %v1148_v39, %s3161_s2 }
0x164f   :  { %v1120_v60 = vpop.permute.xlu1 %1119 }
0x1650   :  { %v3568_v62 = vmul.f32 %v2977_v15, %v1120_v60 }
0x1652   :  { %v1128_v0 = vrot.slane %v3568_v62, 2 }
0x1653   :  { %v1140_v9 = vpop.permute.xlu1 %1139 }
0x1654   :  { %1129 = vrot.lane.b32.xlu1 %v1128_v0, %s3161_s2  ;;  %v1142_v57 = vsel %vm125_vm2, %v1135_v7, %v1140_v9 }
0x1655   :  { %v1196_v14 = vrot.slane %v1142_v57, 6 }
0x1657   :  { %v1150_v11 = vpop.permute.xlu1 %1149 }
0x1658   :  { %1159 = vrot.lane.b32.xlu1 %v1158_v6, %s3161_s2  ;;  %v1152_v15 = vsel %vm125_vm2, %v1145_v10, %v1150_v11 }
0x1659   :  { %v1199_v17 = vrot.slane %v1152_v15, 4 }
0x16c6   :  { %v1130_v31 = vpop.permute.xlu1 %1129 }
0x16c7   :  { %v1132_v12 = vsel %vm125_vm2, %v1125_v32, %v1130_v31 }
0x16c8   :  { %v1213_v63 = vsel %vm209_vm0, %v1132_v12, %v1196_v14 }
0x16c9   :  { %v1215_v21 = vsel %vm1214_vm4, %v1213_v63, %v1199_v17 }
0x16ca   :  { %v1160_v5 = vpop.permute.xlu1 %1159 }
0x16cb   :  { %v1162_v20 = vsel %vm125_vm2, %v1155_v16, %v1160_v5 }
0x16cc   :  { %v1202_v19 = vrot.slane %v1162_v20, 2 }
0x16ce   :  { %v1217_v23 = vsel %vm1216_vm5, %v1215_v21, %v1202_v19 }
0x16cf   :  { %2320 = vmatmul.mubr.msk.f32.vlgmr.msra.gmra.mrb[8].mxu1 %vm229_vm3, %v1217_v23 }
0x16d0   :  { %1307 = vmatprep.mubr.f32.mxu1 %v3158_v1  ;;  %2855 = vmatpush3.bf16.msra.mxu1 %v3547_v49 }
0x16d1   :  { %2856 = vmatprep.subr.bf16.mxu1 %v3159_v4 }
0x16d4   :  { %2858 = vmatpush3.bf16.msra.mxu1 %v3563_v3 }
0x16d5   :  { %2865 = vmatprep.subr.bf16.mxu1 %v3159_v4 }
0x17a2   :  { %v1304_v28 = vpop.f32.mrb[8].mxu1 }
0x17a3   :  { %v3605_v29 = vadd.f32 %v1304_v28, %v3602_v26  ;;  %v1306_v30 = vpop.f32.mrb[9].mxu1 }
0x17a5   :  { %v1387_v33 = vadd.f32 %v1383_v24, %v3605_v29 }
0x17a7   :  { %2980 = vtanh.f32 %v1387_v33  ;;  %v2322_v2 = vmul.f32 -1.442695, %v1387_v33 }
0x17a9   :  { %2982 = vpow2.f32 %v2322_v2 }
0x17b1   :  { %v2981_v34 = vpop.eup %2980 }
0x17b2   :  { %1397 = vrot.lane.b32.xlu0 %v2981_v34, %s3161_s2 }
0x17b3   :  { %v2983_v35 = vpop.eup %2982 }
0x17b4   :  { %v1391_v39 = vadd.f32 1.0, %v2983_v35 }
0x17b6   :  { %2984 = vrcp.f32 %v1391_v39 }
0x17c0   :  { %v2985_v41 = vpop.eup %2984 }
0x17c1   :  { %v1395_v43 = vmul.f32 0.0, %v2985_v41 }
0x1824   :  { %v1398_v42 = vpop.permute.xlu0 %1397 }
0x1825   :  { %v1400_v38 = vmul.f32 %v2985_v41, %v1398_v42 }
0x1827   :  { %1402 = vrot.lane.b32.xlu1 %v1400_v38, %s3162_s30 }
0x1899   :  { %v1403_v44 = vpop.permute.xlu1 %1402 }
0x189a   :  { %v1405_v45 = vadd.f32 %v1403_v44, %v1395_v43 }
0x189c   :  { %2986 = vtanh.f32 %v1405_v45  ;;  %v1499_v9 = vrot.slane %v1405_v45, 6 }
0x18a6   :  { %v2987_v46 = vpop.eup %2986 }
0x18a7   :  { %1408 = vrot.lane.b32.xlu0 %v2987_v46, %s3161_s2 }
0x1919   :  { %v1409_v8 = vpop.permute.xlu0 %1408 }
0x191a   :  { %v1411_v47 = vmul.f32 %v2985_v41, %v1409_v8 }
0x191c   :  { %1413 = vrot.lane.b32.xlu1 %v1411_v47, %s3162_s30 }
0x198e   :  { %v1414_v50 = vpop.permute.xlu1 %1413 }
0x198f   :  { %2634 = vmatmul.mubr.msk.f32.vlgmr.msra.gmra.mrb[14].mxu0 %vm125_vm2, %v1414_v50 }
0x1990   :  { %2861 = vmatpush3.bf16.msra.mxu0 %v3547_v49  ;;  %2655 = vmatprep.mubr.msk.f32.mxu0 %vm3160_vm1, %v3158_v1 }
0x1991   :  { %2862 = vmatprep.subr.bf16.mxu0 %v3159_v4 }
0x1994   :  { %2864 = vmatpush3.bf16.msra.mxu0 %v3563_v3 }
0x1995   :  { %2871 = vmatprep.subr.bf16.mxu0 %v3159_v4 }
0x1a62   :  { %v1483_v51 = vpop.f32.mrb[14].mxu0 }
0x1a63   :  { %v1488_v52 = vrot.slane %v1483_v51, 6  ;;  %v2635_v53 = vpop.f32.mrb[15].mxu0 }
0x1a65   :  { %v1490_v55 = vadd.f32 %v1488_v52, %v3605_v29 }
0x1a67   :  { %2988 = vtanh.f32 %v1490_v55  ;;  %v2324_v58 = vmul.f32 -1.442695, %v1490_v55 }
0x1a69   :  { %2990 = vpow2.f32 %v2324_v58 }
0x1a71   :  { %v2989_v56 = vpop.eup %2988 }
0x1a72   :  { %1503 = vrot.lane.b32.xlu0 %v2989_v56, %s3161_s2 }
0x1a73   :  { %v2991_v59 = vpop.eup %2990 }
0x1a74   :  { %v1494_v60 = vadd.f32 1.0, %v2991_v59 }
0x1a76   :  { %2992 = vrcp.f32 %v1494_v60 }
0x1a80   :  { %v2993_v0 = vpop.eup %2992 }
0x1a81   :  { %v1501_v10 = vmul.f32 %v2993_v0, %v1499_v9 }
0x1ae4   :  { %v1504_v6 = vpop.permute.xlu0 %1503 }
0x1ae5   :  { %v1506_v7 = vmul.f32 %v2993_v0, %v1504_v6 }
0x1ae7   :  { %1508 = vrot.lane.b32.xlu1 %v1506_v7, %s3162_s30 }
0x1aeb   :  { %1171 = vrot.lane.b32.xlu1 %v3468_v36, %s3162_s30  ;;  %v1174_v36 = vrot.slane %v3397_v18, 2 }
0x1aef   :  { %1179 = vrot.lane.b32.xlu1 %v3483_v61, %s3162_s30  ;;  %v1182_v61 = vrot.slane %v3373_v54, 2 }
0x1af3   :  { %1163 = vrot.lane.b32.xlu1 %v3444_v13, %s3162_s30  ;;  %v1166_v13 = vrot.slane %v3421_v48, 2 }
0x1af7   :  { %1187 = vrot.lane.b32.xlu1 %v3568_v62, %s3162_s30  ;;  %v1190_v62 = vrot.slane %v3350_v27, 2 }
0x1b59   :  { %v1509_v11 = vpop.permute.xlu1 %1508 }
0x1b5a   :  { %v3630_v32 = vadd.f32 %v1509_v11, %v1501_v10 }
0x1b5c   :  { %2994 = vtanh.f32 %v3630_v32  ;;  %v1606_v51 = vrot.slane %v3630_v32, 6 }
0x1b5d   :  { %v1172_v31 = vpop.permute.xlu1 %1171 }
0x1b61   :  { %v1180_v16 = vpop.permute.xlu1 %1179 }
0x1b65   :  { %v1164_v54 = vpop.permute.xlu1 %1163 }
0x1b66   :  { %v2995_v57 = vpop.eup %2994 }
0x1b67   :  { %1514 = vrot.lane.b32.xlu0 %v2995_v57, %s3161_s2 }
0x1b69   :  { %v1188_v19 = vpop.permute.xlu1 %1187 }
0x1b6b   :  { %1175 = vrot.lane.b32.xlu0 %v1174_v36, %s3161_s2 }
0x1b6f   :  { %1183 = vrot.lane.b32.xlu0 %v1182_v61, %s3161_s2 }
0x1b73   :  { %1167 = vrot.lane.b32.xlu0 %v1166_v13, %s3161_s2 }
0x1b77   :  { %1191 = vrot.lane.b32.xlu0 %v1190_v62, %s3161_s2 }
0x1bd9   :  { %v1515_v12 = vpop.permute.xlu0 %1514 }
0x1bda   :  { %v1517_v14 = vmul.f32 %v2993_v0, %v1515_v12 }
0x1bdc   :  { %v1519_v15 = vrot.slane %v1517_v14, 2 }
0x1bdd   :  { %v1176_v18 = vpop.permute.xlu0 %1175 }
0x1bde   :  { %1520 = vrot.lane.b32.xlu1 %v1519_v15, %s3162_s30  ;;  %v1178_v5 = vsel %vm125_vm2, %v1172_v31, %v1176_v18 }
0x1bdf   :  { %v1205_v20 = vrot.slane %v1178_v5, 6 }
0x1be1   :  { %v1184_v63 = vpop.permute.xlu0 %1183 }
0x1be2   :  { %v1186_v27 = vsel %vm125_vm2, %v1180_v16, %v1184_v63 }
0x1be3   :  { %v1208_v24 = vrot.slane %v1186_v27, 4 }
0x1be5   :  { %v1168_v17 = vpop.permute.xlu0 %1167 }
0x1be6   :  { %v1170_v48 = vsel %vm125_vm2, %v1164_v54, %v1168_v17 }
0x1be7   :  { %v1218_v21 = vsel %vm209_vm0, %v1170_v48, %v1205_v20 }
0x1be8   :  { %v1219_v30 = vsel %vm1214_vm4, %v1218_v21, %v1208_v24 }
0x1be9   :  { %v1192_v23 = vpop.permute.xlu0 %1191 }
0x1bea   :  { %v1194_v22 = vsel %vm125_vm2, %v1188_v19, %v1192_v23 }
0x1beb   :  { %v1211_v28 = vrot.slane %v1194_v22, 2 }
0x1bed   :  { %v1220_v33 = vsel %vm1216_vm5, %v1219_v30, %v1211_v28 }
0x1bee   :  { %2321 = vmatmul.mubr.msk.f32.gmra.mrb[10].mxu1 %vm229_vm3, %v1220_v33 }
0x1bef   :  { %2644 = vmatprep.mubr.msk.f32.mxu1 %vm3160_vm1, %v3158_v1 }
0x1c50   :  { %v1521_v34 = vpop.permute.xlu1 %1520 }
0x1c51   :  { %2645 = vmatmul.mubr.msk.f32.vlgmr.msra.gmra.mrb[12].mxu1 %vm125_vm2, %v1521_v34 }
0x1c52   :  { %2867 = vmatpush3.bf16.msra.mxu1 %v3547_v49  ;;  %2666 = vmatprep.mubr.msk.f32.mxu1 %vm3160_vm1, %v3158_v1 }
0x1c53   :  { %2868 = vmatprep.subr.bf16.mxu1 %v3159_v4 }
0x1c56   :  { %2870 = vmatpush3.bf16.msra.mxu1 %v3563_v3 }
0x1c57   :  { %2877 = vmatprep.subr.bf16.mxu1 %v3159_v4 }
0x1cc1   :  { %v3660_v2 = vpop.f32.mrb[10].mxu1 }
0x1cc2   :  { %v3662_v35 = vpop.f32.mrb[11].mxu1  ;;  %v3691_v5 = vadd.f32 %v3660_v2, %v3602_v26 }
0x1d24   :  { %v1590_v39 = vpop.f32.mrb[12].mxu1 }
0x1d25   :  { %v1595_v41 = vrot.slane %v1590_v39, 4  ;;  %v2646_v42 = vpop.f32.mrb[13].mxu1 }
0x1d27   :  { %v1597_v38 = vadd.f32 %v1595_v41, %v3605_v29 }
0x1d29   :  { %2996 = vtanh.f32 %v1597_v38  ;;  %v2326_v44 = vmul.f32 -1.442695, %v1597_v38 }
0x1d2b   :  { %2998 = vpow2.f32 %v2326_v44 }
0x1d33   :  { %v2997_v43 = vpop.eup %2996 }
0x1d34   :  { %1610 = vrot.lane.b32.xlu0 %v2997_v43, %s3161_s2 }
0x1d35   :  { %v2999_v45 = vpop.eup %2998 }
0x1d36   :  { %v1601_v46 = vadd.f32 1.0, %v2999_v45 }
0x1d38   :  { %3000 = vrcp.f32 %v1601_v46 }
0x1d42   :  { %v3001_v8 = vpop.eup %3000 }
0x1d43   :  { %v1608_v52 = vmul.f32 %v3001_v8, %v1606_v51 }
0x1da6   :  { %v1611_v47 = vpop.permute.xlu0 %1610 }
0x1da7   :  { %v1613_v50 = vmul.f32 %v3001_v8, %v1611_v47 }
0x1da9   :  { %1615 = vrot.lane.b32.xlu1 %v1613_v50, %s3162_s30 }
0x1e1b   :  { %v1616_v53 = vpop.permute.xlu1 %1615 }
0x1e1c   :  { %v1618_v55 = vadd.f32 %v1616_v53, %v1608_v52 }
0x1e1e   :  { %3002 = vtanh.f32 %v1618_v55  ;;  %v1713_v31 = vrot.slane %v1618_v55, 6 }
0x1e28   :  { %v3003_v56 = vpop.eup %3002 }
0x1e29   :  { %1621 = vrot.lane.b32.xlu0 %v3003_v56, %s3161_s2 }
0x1e9b   :  { %v1622_v58 = vpop.permute.xlu0 %1621 }
0x1e9c   :  { %v1624_v59 = vmul.f32 %v3001_v8, %v1622_v58 }
0x1e9e   :  { %v1626_v60 = vrot.slane %v1624_v59, 4 }
0x1ea0   :  { %1627 = vrot.lane.b32.xlu1 %v1626_v60, %s3162_s30 }
0x1f12   :  { %v1628_v0 = vpop.permute.xlu1 %1627 }
0x1f13   :  { %2656 = vmatmul.mubr.msk.f32.vlgmr.msra.gmra.mrb[16].mxu0 %vm125_vm2, %v1628_v0 }
0x1f14   :  { %2873 = vmatpush3.bf16.msra.mxu0 %v3547_v49  ;;  %2677 = vmatprep.mubr.msk.f32.mxu0 %vm3160_vm1, %v3158_v1 }
0x1f15   :  { %2874 = vmatprep.subr.bf16.mxu0 %v3159_v4 }
0x1f18   :  { %2876 = vmatpush3.bf16.msra.mxu0 %v3563_v3 }
0x1f19   :  { %2883 = vmatprep.subr.bf16.mxu0 %v3159_v4 }
0x1fe6   :  { %v1697_v6 = vpop.f32.mrb[16].mxu0 }
0x1fe7   :  { %v1702_v7 = vrot.slane %v1697_v6, 2  ;;  %v2657_v9 = vpop.f32.mrb[17].mxu0 }
0x1fe9   :  { %v1704_v10 = vadd.f32 %v1702_v7, %v3605_v29 }
0x1feb   :  { %3004 = vtanh.f32 %v1704_v10  ;;  %v2328_v32 = vmul.f32 -1.442695, %v1704_v10 }
0x1fed   :  { %3006 = vpow2.f32 %v2328_v32 }
0x1ff5   :  { %v3005_v11 = vpop.eup %3004 }
0x1ff6   :  { %1717 = vrot.lane.b32.xlu0 %v3005_v11, %s3161_s2 }
0x1ff7   :  { %v3007_v57 = vpop.eup %3006 }
0x1ff8   :  { %v1708_v36 = vadd.f32 1.0, %v3007_v57 }
0x1ffa   :  { %3008 = vrcp.f32 %v1708_v36 }
0x2004   :  { %v3009_v61 = vpop.eup %3008 }
0x2005   :  { %v1715_v12 = vmul.f32 %v3009_v61, %v1713_v31 }
0x2068   :  { %v1718_v13 = vpop.permute.xlu0 %1717 }
0x2069   :  { %v1720_v62 = vmul.f32 %v3009_v61, %v1718_v13 }
0x206b   :  { %1722 = vrot.lane.b32.xlu1 %v1720_v62, %s3162_s30 }
0x20dd   :  { %v1723_v14 = vpop.permute.xlu1 %1722 }
0x20de   :  { %v1725_v15 = vadd.f32 %v1723_v14, %v1715_v12 }
0x20e0   :  { %3010 = vtanh.f32 %v1725_v15  ;;  %v1817_v26 = vrot.slane %v1725_v15, 6 }
0x20ea   :  { %v3011_v29 = vpop.eup %3010 }
0x20eb   :  { %1728 = vrot.lane.b32.xlu0 %v3011_v29, %s3161_s2 }
0x215d   :  { %v1729_v16 = vpop.permute.xlu0 %1728 }
0x215e   :  { %v1731_v18 = vmul.f32 %v3009_v61, %v1729_v16  ;;  %v1229_v16 = vrot.slane %v3597_v25, %v121_v40 }
0x2160   :  { %v1733_v63 = vrot.slane %v1731_v18, 6  ;;  %v1312_v18 = vadd.f32 %v3662_v35, %v1229_v16 }
0x2162   :  { %1734 = vrot.lane.b32.xlu1 %v1733_v63, %s3162_s30 }
0x21d4   :  { %v1735_v54 = vpop.permute.xlu1 %1734 }
0x21d5   :  { %2667 = vmatmul.mubr.msk.f32.vlgmr.msra.gmra.mrb[14].mxu1 %vm125_vm2, %v1735_v54 }
0x21d6   :  { %2879 = vmatpush3.bf16.msra.mxu1 %v3547_v49  ;;  %2688 = vmatprep.mubr.msk.f32.mxu1 %vm3160_vm1, %v3158_v1 }
0x21d7   :  { %2880 = vmatprep.subr.bf16.mxu1 %v3159_v4 }
0x21da   :  { %2882 = vmatpush3.bf16.msra.mxu1 %v3563_v3 }
0x21db   :  { %2889 = vmatprep.subr.bf16.mxu1 %v3159_v4 }
0x22a8   :  { %v1804_v17 = vpop.f32.mrb[14].mxu1 }
0x22a9   :  { %v1808_v48 = vadd.f32 %v1804_v17, %v3691_v5  ;;  %v2668_v20 = vpop.f32.mrb[15].mxu1 }
0x22aa   :  { %v2337_v20 = vmul.f32 -1.442695, %v1312_v18 }
0x22ab   :  { %3012 = vtanh.f32 %v1808_v48  ;;  %v2330_v19 = vmul.f32 -1.442695, %v1808_v48 }
0x22ad   :  { %3014 = vpow2.f32 %v2330_v19 }
0x22b5   :  { %v3013_v27 = vpop.eup %3012 }
0x22b6   :  { %1821 = vrot.lane.b32.xlu0 %v3013_v27, %s3161_s2 }
0x22b7   :  { %v3015_v21 = vpop.eup %3014 }
0x22b8   :  { %v1812_v23 = vadd.f32 1.0, %v3015_v21 }
0x22ba   :  { %3016 = vrcp.f32 %v1812_v23 }
0x22c4   :  { %v3017_v24 = vpop.eup %3016 }
0x22c5   :  { %v1819_v30 = vmul.f32 %v3017_v24, %v1817_v26 }
0x2328   :  { %v1822_v22 = vpop.permute.xlu0 %1821 }
0x2329   :  { %v1824_v28 = vmul.f32 %v3017_v24, %v1822_v22 }
0x232b   :  { %1826 = vrot.lane.b32.xlu1 %v1824_v28, %s3162_s30 }
0x239d   :  { %v1827_v33 = vpop.permute.xlu1 %1826 }
0x239e   :  { %v1829_v34 = vadd.f32 %v1827_v33, %v1819_v30 }
0x23a0   :  { %3018 = vtanh.f32 %v1829_v34 }
0x23aa   :  { %v3019_v2 = vpop.eup %3018 }
0x23ab   :  { %1832 = vrot.lane.b32.xlu0 %v3019_v2, %s3161_s2 }
0x241d   :  { %v1833_v39 = vpop.permute.xlu0 %1832 }
0x241e   :  { %v1835_v41 = vmul.f32 %v3017_v24, %v1833_v39 }
0x2420   :  { %1837 = vrot.lane.b32.xlu1 %v1835_v41, %s3162_s30 }
0x2492   :  { %v1838_v42 = vpop.permute.xlu1 %1837 }
0x2493   :  { %2678 = vmatmul.mubr.msk.f32.vlgmr.msra.gmra.mrb[18].mxu0 %vm125_vm2, %v1838_v42 }
0x2494   :  { %2885 = vmatpush3.bf16.msra.mxu0 %v3547_v49  ;;  %2699 = vmatprep.mubr.msk.f32.mxu0 %vm3160_vm1, %v3158_v1 }
0x2495   :  { %2886 = vmatprep.subr.bf16.mxu0 %v3159_v4 }
0x2498   :  { %2888 = vmatpush3.bf16.msra.mxu0 %v3563_v3  ;;  %v1923_v3 = vrot.slane %v1829_v34, 6 }
0x2566   :  { %v1907_v38 = vpop.f32.mrb[18].mxu0 }
0x2567   :  { %v1912_v43 = vrot.slane %v1907_v38, 6  ;;  %v2679_v44 = vpop.f32.mrb[19].mxu0 }
0x2569   :  { %v1914_v45 = vadd.f32 %v1912_v43, %v3691_v5 }
0x256b   :  { %3020 = vtanh.f32 %v1914_v45  ;;  %v2332_v8 = vmul.f32 -1.442695, %v1914_v45 }
0x256d   :  { %3022 = vpow2.f32 %v2332_v8 }
0x2575   :  { %v3021_v46 = vpop.eup %3020 }
0x2576   :  { %1927 = vrot.lane.b32.xlu0 %v3021_v46, %s3161_s2 }
0x2577   :  { %v3023_v47 = vpop.eup %3022 }
0x2578   :  { %v1918_v49 = vadd.f32 1.0, %v3023_v47 }
0x257a   :  { %3024 = vrcp.f32 %v1918_v49  ;;  %v2189_v49 = vld [vmem:[%s3782_s7] sm:$0xff] }
0x2584   :  { %v3025_v50 = vpop.eup %3024 }
0x2585   :  { %v1925_v53 = vmul.f32 %v3025_v50, %v1923_v3  ;;  %v2192_v3 = vld [vmem:[%s3782_s7 + $0x18] sm:$0xff] }
0x25e8   :  { %v1928_v51 = vpop.permute.xlu0 %1927 }
0x25e9   :  { %v1930_v52 = vmul.f32 %v3025_v50, %v1928_v51  ;;  %v2191_v51 = vld [vmem:[%s3782_s7 + $0x10] sm:$0xff] }
0x25eb   :  { %1932 = vrot.lane.b32.xlu1 %v1930_v52, %s3162_s30 }
0x265d   :  { %v1933_v55 = vpop.permute.xlu1 %1932 }
0x265e   :  { %v1935_v56 = vadd.f32 %v1933_v55, %v1925_v53  ;;  %v2893_v53 = vpack.c.bf16 %v2192_v3, %v2191_v51  ;;  %v2193_v55 = vld [vmem:[%s3782_s7 + $0x20] sm:$0xff] }
0x2660   :  { %3026 = vtanh.f32 %v1935_v56 }
0x266a   :  { %v3027_v58 = vpop.eup %3026 }
0x266b   :  { %1938 = vrot.lane.b32.xlu0 %v3027_v58, %s3161_s2 }
0x26dd   :  { %v1939_v59 = vpop.permute.xlu0 %1938 }
0x26de   :  { %v1941_v60 = vmul.f32 %v3025_v50, %v1939_v59  ;;  %v2190_v50 = vld [vmem:[%s3782_s7 + $0x8] sm:$0xff] }
0x26df   :  { %v2890_v52 = vpack.c.bf16 %v2190_v50, %v2189_v49 }
0x26e0   :  { %v1943_v0 = vrot.slane %v1941_v60, 2  ;;  %v2195_v60 = vld [vmem:[%s3782_s7 + $0x30] sm:$0xff] }
0x26e2   :  { %1944 = vrot.lane.b32.xlu1 %v1943_v0, %s3162_s30  ;;  %v2196_v0 = vld [vmem:[%s3782_s7 + $0x38] sm:$0xff] }
0x2754   :  { %v1945_v6 = vpop.permute.xlu1 %1944 }
0x2755   :  { %2689 = vmatmul.mubr.msk.f32.vlgmr.msra.gmra.mrb[16].mxu1 %vm125_vm2, %v1945_v6  ;;  %v2899_v6 = vpack.c.bf16 %v2196_v0, %v2195_v60 }
0x2756   :  { %2718 = vmatprep.mubr.msk.f32.mxu1 %vm3160_vm1, %v3158_v1  ;;  %v2030_v1 = vrot.slane %v1935_v56, 6  ;;  %2891 = vmatpush3.bf16.msra.mxu1 %v2890_v52  ;;  %v2194_v56 = vld [vmem:[%s3782_s7 + $0x28] sm:$0xff]  ;;  %s3163_s7 = smov [#allocation8]  }
0x2757   :  { %2892 = vmatprep.subr.bf16.mxu1 %v3159_v4  ;;  %v2896_v58 = vpack.c.bf16 %v2194_v56, %v2193_v55 }
0x275a   :  { %2894 = vmatpush3.bf16.msra.mxu1 %v2893_v53 }
0x275b   :  { %2895 = vmatprep.subr.bf16.mxu1 %v3159_v4 }
0x275e   :  { %2897 = vmatpush3.bf16.msra.mxu1 %v2896_v58 }
0x275f   :  { %2898 = vmatprep.subr.bf16.mxu1 %v3159_v4  ;;  %v2338_v4 = vld [vmem:[%s3783_s8] ss:$0 sm:$0xff] }
0x2762   :  { %2900 = vmatpush3.bf16.msra.mxu1 %v2899_v6 }
0x2828   :  { %v2014_v7 = vpop.f32.mrb[16].mxu1 }
0x2829   :  { %v2019_v9 = vrot.slane %v2014_v7, 4  ;;  %v2690_v10 = vpop.f32.mrb[17].mxu1 }
0x282b   :  { %v2021_v11 = vadd.f32 %v2019_v9, %v3691_v5 }
0x282d   :  { %3028 = vtanh.f32 %v2021_v11  ;;  %v2334_v57 = vmul.f32 -1.442695, %v2021_v11 }
0x282f   :  { %3030 = vpow2.f32 %v2334_v57 }
0x2837   :  { %v3029_v32 = vpop.eup %3028 }
0x2838   :  { %2034 = vrot.lane.b32.xlu0 %v3029_v32, %s3161_s2 }
0x2839   :  { %v3031_v36 = vpop.eup %3030 }
0x283a   :  { %v2025_v61 = vadd.f32 1.0, %v3031_v36 }
0x283c   :  { %3032 = vrcp.f32 %v2025_v61 }
0x2846   :  { %v3033_v13 = vpop.eup %3032 }
0x2847   :  { %v2032_v12 = vmul.f32 %v3033_v13, %v2030_v1 }
0x28aa   :  { %v2035_v62 = vpop.permute.xlu0 %2034 }
0x28ab   :  { %v2037_v31 = vmul.f32 %v3033_v13, %v2035_v62 }
0x28ad   :  { %2039 = vrot.lane.b32.xlu1 %v2037_v31, %s3162_s30 }
0x291f   :  { %v2040_v14 = vpop.permute.xlu1 %2039 }
0x2920   :  { %v2042_v15 = vadd.f32 %v2040_v14, %v2032_v12 }
0x2922   :  { %3034 = vtanh.f32 %v2042_v15  ;;  %v2137_v46 = vrot.slane %v2042_v15, 6 }
0x2923   :  { %3036 = vtanh.f32 %v1312_v18 }
0x2924   :  { %3038 = vpow2.f32 %v2337_v20 }
0x292c   :  { %v3035_v29 = vpop.eup %3034 }
0x292d   :  { %2045 = vrot.lane.b32.xlu0 %v3035_v29, %s3161_s2  ;;  %v3037_v48 = vpop.eup %3036 }
0x292e   :  { %v3039_v27 = vpop.eup %3038 }
0x292f   :  { %v2159_v19 = vadd.f32 1.0, %v3039_v27 }
0x2931   :  { %3040 = vrcp.f32 %v2159_v19 }
0x293b   :  { %v3041_v37 = vpop.eup %3040 }
0x293c   :  { %v2163_v35 = vmul.f32 0.0, %v3041_v37 }
0x299f   :  { %v2046_v63 = vpop.permute.xlu0 %2045 }
0x29a0   :  { %v2048_v54 = vmul.f32 %v3033_v13, %v2046_v63 }
0x29a2   :  { %v2050_v17 = vrot.slane %v2048_v54, 4 }
0x29a4   :  { %2051 = vrot.lane.b32.xlu1 %v2050_v17, %s3162_s30 }
0x29a8   :  { %2165 = vrot.lane.b32.xlu1 %v3037_v48, %s3161_s2 }
0x2a16   :  { %v2052_v21 = vpop.permute.xlu1 %2051 }
0x2a17   :  { %2700 = vmatmul.mubr.msk.f32.vlgmr.msra.gmra.mrb[20].mxu0 %vm125_vm2, %v2052_v21 }
0x2a1a   :  { %v2166_v40 = vpop.permute.xlu1 %2165 }
0x2a1b   :  { %v2168_v25 = vmul.f32 %v3041_v37, %v2166_v40 }
0x2a1d   :  { %2170 = vrot.lane.b32.xlu1 %v2168_v25, %s3162_s30 }
0x2a8f   :  { %v2171_v23 = vpop.permute.xlu1 %2170 }
0x2a90   :  { %v2173_v24 = vadd.f32 %v2171_v23, %v2163_v35 }
0x2a92   :  { %3042 = vtanh.f32 %v2173_v24 }
0x2a9c   :  { %v3043_v22 = vpop.eup %3042 }
0x2a9d   :  { %2176 = vrot.lane.b32.xlu1 %v3043_v22, %s3161_s2 }
0x2aea   :  { %v2121_v28 = vpop.f32.mrb[20].mxu0 }
0x2aeb   :  { %v2126_v26 = vrot.slane %v2121_v28, 2  ;;  %v2701_v30 = vpop.f32.mrb[21].mxu0 }
0x2aed   :  { %v2128_v33 = vadd.f32 %v2126_v26, %v3691_v5 }
0x2aef   :  { %3044 = vtanh.f32 %v2128_v33  ;;  %v2336_v41 = vmul.f32 -1.442695, %v2128_v33 }
0x2af1   :  { %3046 = vpow2.f32 %v2336_v41 }
0x2af9   :  { %v3045_v34 = vpop.eup %3044 }
0x2afa   :  { %2141 = vrot.lane.b32.xlu0 %v3045_v34, %s3161_s2 }
0x2afb   :  { %v3047_v42 = vpop.eup %3046 }
0x2afc   :  { %v2132_v38 = vadd.f32 1.0, %v3047_v42 }
0x2afe   :  { %3048 = vrcp.f32 %v2132_v38 }
0x2b08   :  { %v3049_v43 = vpop.eup %3048 }
0x2b09   :  { %v2139_v5 = vmul.f32 %v3049_v43, %v2137_v46 }
0x2b0f   :  { %v2177_v2 = vpop.permute.xlu1 %2176 }
0x2b10   :  { %v2179_v39 = vmul.f32 %v3041_v37, %v2177_v2 }
0x2b12   :  { %2185 = vrot.lane.b32.xlu1 %v2179_v39, %s3161_s2 }
0x2b6c   :  { %v2142_v44 = vpop.permute.xlu0 %2141 }
0x2b6d   :  { %v2144_v45 = vmul.f32 %v3049_v43, %v2142_v44 }
0x2b6f   :  { %2146 = vrot.lane.b32.xlu0 %v2144_v45, %s3162_s30 }
0x2b84   :  { %v2186_v10 = vpop.permute.xlu1 %2185 }
0x2be1   :  { %v2147_v8 = vpop.permute.xlu0 %2146 }
0x2be2   :  { %v2149_v47 = vadd.f32 %v2147_v8, %v2139_v5 }
0x2be4   :  { %3050 = vtanh.f32 %v2149_v47 }
0x2bee   :  { %v3051_v59 = vpop.eup %3050 }
0x2bef   :  { %2152 = vrot.lane.b32.xlu0 %v3051_v59, %s3161_s2 }
0x2c61   :  { %v2153_v7 = vpop.permute.xlu0 %2152 }
0x2c62   :  { %v2155_v9 = vmul.f32 %v3049_v43, %v2153_v7 }
0x2c64   :  { %2181 = vrot.lane.b32.xlu0 %v2155_v9, %s3162_s30  ;;  %s2292_s30 = sshll.u32 %s3163_s7, 4  ;;  %s2293_s30 = int_to_ptr.vmem [resolvable:$true] %s2292_s30 }
0x2c65   :  { %s3122_s12 = scalar_lea.vmem %s2293_s30, 32  ;;  %p3127_p11 = scmp.lt.s32.totalorder %s2293_s30, %s2293_s30 }
0x2c66   :  { %p3123_p10 = scmp.ne.s32.totalorder %s2293_s30, %s3122_s12  ;;  %p3128_p12 = scmp.lt.s32.totalorder %s3122_s12, %s3122_s12 }
0x2c68   :  { %p3129_p13 = por %p3128_p12, %p3127_p11 }
0x2c6a   :  { %p3130_p0 = pnand %p3129_p13, %p3123_p10 }
0x2cd6   :  { %v2182_v11 = vpop.permute.xlu0 %2181 }
0x2cd7   :  { %v2188_v32 = vsel %vm125_vm2, %v2182_v11, %v2186_v10 }
0x2cd8   :  { %v2205_v57 = vrot.slane %v2188_v32, 6 }
0x2cda   :  { %2719 = vmatmul.mubr.msk.f32.vlgmr.msra.gmra.mrb[18].mxu1 %vm229_vm3, %v2205_v57 }
0x2dad   :  { %v2274_v36 = vpop.f32.mrb[18].mxu1 }
0x2dae   :  { %v2275_v61 = vadd.f32 %v2338_v4, %v2274_v36  ;;  %v2720_v13 = vpop.f32.mrb[19].mxu1 }
0x2db0   :  { %v2340_v62 = vmul.f32 -1.442695, %v2275_v61 }
0x2db2   :  { %3052 = vpow2.f32 %v2340_v62 }
0x2dbc   :  { %v3053_v31 = vpop.eup %3052 }
0x2dbd   :  { %v2281_v1 = vadd.f32 1.0, %v3053_v31 }
0x2dbf   :  { %3054 = vrcp.f32 %v2281_v1 }
0x2dc9   :  { %v3055_v12 = vpop.eup %3054 }
0x2dca   :  { %2285 = vst.msk [vmem:[#allocation8] sm:$0x3] %vm2284_vm6, %v3055_v12 }
0x2dcb   :  { %3133 = shalt.err (!%p3130_p0)
}
0x2dcc   :  { %s3134_s10 = scalar_lea.hbm %s3784_s9, 32 }
0x2dcd   :  { %p3135_p1 = scmp.ne.s32.totalorder %s3784_s9, %s3134_s10  ;;  %p3138_p2 = scmp.lt.u32.totalorder %s3134_s10, %s3784_s9 }
0x2dcf   :  { %p3140_p3 = pnand %p3138_p2, %p3135_p1 }
0x2dd1   :  { %3143 = shalt.err (!%p3140_p3)
}
0x2dd2   :  { %2295 = dma.vmem_to_hbm [thread:$0]  %s2293_s30, 32, %s3784_s9, [#allocation4]  }
0x2dd3   :  { %3148 = dma.done.wait [#allocation4], 32  }
0x2dd4   :  { %3149 = vsyncadd [#allocation4], 4294967264 }
0x2dd5   :  { %2299 = vsyncpa [#allocation3], 1 }
0x2dd6   :  { %2300 = vsyncpa [#allocation6], 1 }
0x2dd7   :  { %2301 = vsyncpa [#allocation4], 1 }

</bundles_post_ra>
